<compile_context>
chip_gen: v7x
topology: tpu7x:2x2x1
jax: 0.10.0
libtpu: 0.0.40
codegen_flags: <defaults>
</compile_context>

<pallas_src>
import jax
import jax.numpy as jnp
from jax.experimental import pallas as pl
from jax.experimental.pallas import tpu as pltpu

IN_DIM = 28 * 28  # 784
ENC_DIMS = [IN_DIM, 128, 64, 32, 2]
DEC_DIMS = [2, 32, 64, 128, IN_DIM]


def _round_up(n, m):
    return ((n + m - 1) // m) * m


# ---------------------------------------------------------------------------
# Kernel: full fused autoencoder forward for one (bm, 784) batch tile.
# ---------------------------------------------------------------------------
def _mlp_kernel(x_ref,
                w1, b1, w2, b2, w3, b3, w45, b45,   # encoder (latent fused in)
                w6, b6, w7, b7, w8, b8,             # decoder
                out_ref):

    def linear_relu(h, w_ref, b_ref):
        y = jnp.dot(h, w_ref[...], preferred_element_type=jnp.float32)
        y = y + b_ref[...]
        return jnp.maximum(y, 0.0).astype(jnp.bfloat16)

    h = x_ref[...].astype(jnp.bfloat16)

    # encoder: 784 -> 128 -> 64 -> 32 (ReLU after each)
    h = linear_relu(h, w1, b1)
    h = linear_relu(h, w2, b2)
    h = linear_relu(h, w3, b3)
    # fused bottleneck: 32 -> [2] -> 32, then ReLU (decoder's first ReLU)
    h = linear_relu(h, w45, b45)
    # decoder: 32 -> 64 -> 128 (ReLU after each)
    h = linear_relu(h, w6, b6)
    h = linear_relu(h, w7, b7)
    # final 128 -> 784, Tanh, stored in the output dtype
    y = jnp.dot(h, w8[...], preferred_element_type=jnp.float32) + b8[...]
    out_ref[...] = jnp.tanh(y).astype(out_ref.dtype)


# ---------------------------------------------------------------------------
# Parameters
# ---------------------------------------------------------------------------
def init_params(key):
    """PyTorch-nn.Linear-style uniform(-1/sqrt(fan_in), +) init.

    Weights stored as (in_features, out_features) f32, biases (1, out) f32.
    """
    params = []
    dims = list(zip(ENC_DIMS[:-1], ENC_DIMS[1:])) + list(zip(DEC_DIMS[:-1], DEC_DIMS[1:]))
    for fan_in, fan_out in dims:
        key, kw, kb = jax.random.split(key, 3)
        bound = 1.0 / float(fan_in) ** 0.5
        w = jax.random.uniform(kw, (fan_in, fan_out), jnp.float32, -bound, bound)
        b = jax.random.uniform(kb, (1, fan_out), jnp.float32, -bound, bound)
        params.append((w, b))
    return params


def prepare_params(params):
    """Fuse the activation-free 32->2->32 bottleneck and cast weights to bf16.

    Call ONCE outside the per-forward hot path; pass the result to
    `basical_forward`.  Biases stay f32.
    """
    (w1, b1), (w2, b2), (w3, b3), (w4, b4), (w5, b5), (w6, b6), (w7, b7), (w8, b8) = params
    w45 = jnp.dot(w4, w5)            # (32, 32)
    b45 = jnp.dot(b4, w5) + b5       # (1, 32)
    fused = [(w1, b1), (w2, b2), (w3, b3), (w45, b45), (w6, b6), (w7, b7), (w8, b8)]
    flat = []
    for w, b in fused:
        flat.append(w.astype(jnp.bfloat16))
        flat.append(b.astype(jnp.float32))
    return tuple(flat)


# ---------------------------------------------------------------------------
# Wrapper
# ---------------------------------------------------------------------------
def _choose_batch_tile(B, bm):
    bm = max(8, (bm // 8) * 8)
    if B <= bm:
        return B                       # one block == full batch (always legal)
    n_steps = pl.cdiv(B, bm)           # >= 2: balanced tiles keep both v7x TCs busy
    return _round_up(pl.cdiv(B, n_steps), 8)


def basical_forward(x, flat_params, *, bm=1024, vmem_limit_bytes=48 * 1024 * 1024):
    """x: (B, 784)  ->  (B, 1, 28, 28); output dtype follows x.dtype.

    flat_params: output of `prepare_params(params)`.
    bm: batch tile (rounded to a multiple of 8); 1024 amortizes the per-step
        pipeline overhead on all chips within the explicit 48 MiB VMEM limit.
    """
    B, D = x.shape
    assert D == IN_DIM

    bm_eff = _choose_batch_tile(B, bm)
    grid = (pl.cdiv(B, bm_eff),)

    # Advisory cost estimate so XLA schedules surrounding ops sensibly.
    flops_per_row = 2 * sum(
        flat_params[2 * k].shape[0] * flat_params[2 * k].shape[1]
        for k in range(len(flat_params) // 2)
    )
    param_bytes = sum(int(t.size) * t.dtype.itemsize for t in flat_params)
    cost = pl.CostEstimate(
        flops=int(B) * int(flops_per_row),
        transcendentals=int(B) * IN_DIM,                       # tanh
        bytes_accessed=int(B) * IN_DIM * 2 * x.dtype.itemsize + param_bytes,
    )

    def run(single_buffer_weights):
        # Weights/biases: full-array blocks, same block every grid step
        # (fetched once, resident in VMEM).  Single-buffer them when possible.
        if single_buffer_weights:
            w_specs = [pl.BlockSpec(t.shape, lambda i: (0, 0),
                                    pipeline_mode=pl.Buffered(1))
                       for t in flat_params]
        else:
            w_specs = [pl.BlockSpec(t.shape, lambda i: (0, 0)) for t in flat_params]

        return pl.pallas_call(
            _mlp_kernel,
            out_shape=jax.ShapeDtypeStruct((B, IN_DIM), x.dtype),
            grid_spec=pltpu.PrefetchScalarGridSpec(
                num_scalar_prefetch=0,
                grid=grid,
                in_specs=[pl.BlockSpec((bm_eff, IN_DIM), lambda i: (i, 0))] + w_specs,
                out_specs=pl.BlockSpec((bm_eff, IN_DIM), lambda i: (i, 0)),
            ),
            compiler_params=pltpu.CompilerParams(
                dimension_semantics=("parallel",),
                vmem_limit_bytes=vmem_limit_bytes,
            ),
            cost_estimate=cost,
        )(x, *flat_params)

    try:
        out = run(True)
    except Exception:
        # Fallback for JAX versions where BlockSpec.pipeline_mode / Buffered(1)
        # is unsupported: default double-buffered weight blocks (~0.5 MiB more VMEM).
        out = run(False)

    return out.reshape(-1, 1, 28, 28)


# ---------------------------------------------------------------------------
# Self-test
# ---------------------------------------------------------------------------
if __name__ == "__main__":
    key = jax.random.PRNGKey(0)
    kx, kp = jax.random.split(key)

    B = 8
    x = jax.random.normal(kx, (B, IN_DIM), dtype=jnp.float32)

    params = init_params(kp)
    flat_params = prepare_params(params)       # hoisted out of the hot path

    y = basical_forward(x, flat_params)
    jax.block_until_ready(y)

    assert y.shape == (B, 1, 28, 28)
    assert y.dtype == jnp.float32
    assert bool(jnp.all(jnp.abs(y) <= 1.0 + 1e-6))          # tanh range

    # Reference 1: same processed params (fused bottleneck, bf16 weights,
    # f32 accumulation) in plain JAX -> should match the kernel very closely.
    def ref_forward_bf16(x, flat):
        pairs = [(flat[2 * k], flat[2 * k + 1]) for k in range(len(flat) // 2)]
        h = x.astype(jnp.bfloat16)
        for li, (w, b) in enumerate(pairs):
            yv = jnp.dot(h, w, preferred_element_type=jnp.float32) + b
            if li < len(pairs) - 1:
                h = jnp.maximum(yv, 0.0).astype(jnp.bfloat16)
            else:
                h = jnp.tanh(yv)
        return h.reshape(-1, 1, 28, 28)

    y_ref_bf16 = ref_forward_bf16(x, flat_params)
    assert bool(jnp.allclose(y, y_ref_bf16, atol=1e-2, rtol=0.0))

    # Reference 2: original unfused full-f32 math (looser tolerance covers the
    # deliberate bf16-matmul / bottleneck-fusion numerics change).
    def ref_forward_f32(x, params):
        h = x
        for li, (w, b) in enumerate(params):
            h = h @ w + b
            if li in (0, 1, 2, 4, 5, 6):
                h = jnp.maximum(h, 0.0)
            elif li == 7:
                h = jnp.tanh(h)
        return h.reshape(-1, 1, 28, 28)

    y_ref_f32 = ref_forward_f32(x, params)
    assert bool(jnp.allclose(y, y_ref_f32, atol=1e-1, rtol=0.0))

    print("KERNEL_OK")
</pallas_src>

<mosaic_0001>
module attributes {stable_mosaic.version = 11 : i64} {
  func.func @_mlp_kernel(%arg0: i32, %arg1: memref<8x784xf32, #tpu.memory_space<vmem>>, %arg2: memref<784x128xbf16, #tpu.memory_space<vmem>>, %arg3: memref<1x128xf32, #tpu.memory_space<vmem>>, %arg4: memref<128x64xbf16, #tpu.memory_space<vmem>>, %arg5: memref<1x64xf32, #tpu.memory_space<vmem>>, %arg6: memref<64x32xbf16, #tpu.memory_space<vmem>>, %arg7: memref<1x32xf32, #tpu.memory_space<vmem>>, %arg8: memref<32x32xbf16, #tpu.memory_space<vmem>>, %arg9: memref<1x32xf32, #tpu.memory_space<vmem>>, %arg10: memref<32x64xbf16, #tpu.memory_space<vmem>>, %arg11: memref<1x64xf32, #tpu.memory_space<vmem>>, %arg12: memref<64x128xbf16, #tpu.memory_space<vmem>>, %arg13: memref<1x128xf32, #tpu.memory_space<vmem>>, %arg14: memref<128x784xbf16, #tpu.memory_space<vmem>>, %arg15: memref<1x784xf32, #tpu.memory_space<vmem>>, %arg16: memref<8x784xf32, #tpu.memory_space<vmem>>) attributes {dimension_semantics = [#tpu.dimension_semantics<parallel>], iteration_bounds = array<i64: 1>, scalar_prefetch = 0 : i64, scratch_operands = 0 : i64, tpu.core_type = #tpu.core_type<tc>, window_params = [{transform_indices = @transform_0, window_bounds = array<i64: 8, 784>}, {pipeline_mode = #tpu.pipeline_mode<synchronous>, transform_indices = @transform_1, window_bounds = array<i64: 784, 128>}, {pipeline_mode = #tpu.pipeline_mode<synchronous>, transform_indices = @transform_2, window_bounds = array<i64: 1, 128>}, {pipeline_mode = #tpu.pipeline_mode<synchronous>, transform_indices = @transform_3, window_bounds = array<i64: 128, 64>}, {pipeline_mode = #tpu.pipeline_mode<synchronous>, transform_indices = @transform_4, window_bounds = array<i64: 1, 64>}, {pipeline_mode = #tpu.pipeline_mode<synchronous>, transform_indices = @transform_5, window_bounds = array<i64: 64, 32>}, {pipeline_mode = #tpu.pipeline_mode<synchronous>, transform_indices = @transform_6, window_bounds = array<i64: 1, 32>}, {pipeline_mode = #tpu.pipeline_mode<synchronous>, transform_indices = @transform_7, window_bounds = array<i64: 32, 32>}, {pipeline_mode = #tpu.pipeline_mode<synchronous>, transform_indices = @transform_8, window_bounds = array<i64: 1, 32>}, {pipeline_mode = #tpu.pipeline_mode<synchronous>, transform_indices = @transform_9, window_bounds = array<i64: 32, 64>}, {pipeline_mode = #tpu.pipeline_mode<synchronous>, transform_indices = @transform_10, window_bounds = array<i64: 1, 64>}, {pipeline_mode = #tpu.pipeline_mode<synchronous>, transform_indices = @transform_11, window_bounds = array<i64: 64, 128>}, {pipeline_mode = #tpu.pipeline_mode<synchronous>, transform_indices = @transform_12, window_bounds = array<i64: 1, 128>}, {pipeline_mode = #tpu.pipeline_mode<synchronous>, transform_indices = @transform_13, window_bounds = array<i64: 128, 784>}, {pipeline_mode = #tpu.pipeline_mode<synchronous>, transform_indices = @transform_14, window_bounds = array<i64: 1, 784>}, {transform_indices = @transform_15, window_bounds = array<i64: 8, 784>}]} {
    %c0 = arith.constant 0 : index
    %c0_0 = arith.constant 0 : index
    %0 = vector.load %arg1[%c0, %c0_0] : memref<8x784xf32, #tpu.memory_space<vmem>>, vector<8x784xf32>
    %1 = arith.truncf %0 : vector<8x784xf32> to vector<8x784xbf16>
    %c0_1 = arith.constant 0 : index
    %c0_2 = arith.constant 0 : index
    %2 = vector.load %arg2[%c0_1, %c0_2] : memref<784x128xbf16, #tpu.memory_space<vmem>>, vector<784x128xbf16>
    %cst = arith.constant dense<0.000000e+00> : vector<8x128xf32>
    %3 = tpu.matmul %1, %2, %cst {dimension_numbers = #tpu.dot_dimension_numbers<[1], [0], [0], [1], [0, 0, 1, 1], [], []>} : vector<8x784xbf16>, vector<784x128xbf16>, vector<8x128xf32> -> vector<8x128xf32>
    %c0_3 = arith.constant 0 : index
    %c0_4 = arith.constant 0 : index
    %4 = vector.load %arg3[%c0_3, %c0_4] : memref<1x128xf32, #tpu.memory_space<vmem>>, vector<1x128xf32>
    %5 = vector.broadcast %4 : vector<1x128xf32> to vector<8x128xf32>
    %6 = arith.addf %3, %5 : vector<8x128xf32>
    %cst_5 = arith.constant 0.000000e+00 : f32
    %7 = vector.broadcast %cst_5 : f32 to vector<8x128xf32>
    %8 = arith.maximumf %6, %7 : vector<8x128xf32>
    %9 = arith.truncf %8 : vector<8x128xf32> to vector<8x128xbf16>
    %c0_6 = arith.constant 0 : index
    %c0_7 = arith.constant 0 : index
    %10 = vector.load %arg4[%c0_6, %c0_7] : memref<128x64xbf16, #tpu.memory_space<vmem>>, vector<128x64xbf16>
    %cst_8 = arith.constant dense<0.000000e+00> : vector<8x64xf32>
    %11 = tpu.matmul %9, %10, %cst_8 {dimension_numbers = #tpu.dot_dimension_numbers<[1], [0], [0], [1], [0, 0, 1, 1], [], []>} : vector<8x128xbf16>, vector<128x64xbf16>, vector<8x64xf32> -> vector<8x64xf32>
    %c0_9 = arith.constant 0 : index
    %c0_10 = arith.constant 0 : index
    %12 = vector.load %arg5[%c0_9, %c0_10] : memref<1x64xf32, #tpu.memory_space<vmem>>, vector<1x64xf32>
    %13 = vector.broadcast %12 : vector<1x64xf32> to vector<8x64xf32>
    %14 = arith.addf %11, %13 : vector<8x64xf32>
    %cst_11 = arith.constant 0.000000e+00 : f32
    %15 = vector.broadcast %cst_11 : f32 to vector<8x64xf32>
    %16 = arith.maximumf %14, %15 : vector<8x64xf32>
    %17 = arith.truncf %16 : vector<8x64xf32> to vector<8x64xbf16>
    %c0_12 = arith.constant 0 : index
    %c0_13 = arith.constant 0 : index
    %18 = vector.load %arg6[%c0_12, %c0_13] : memref<64x32xbf16, #tpu.memory_space<vmem>>, vector<64x32xbf16>
    %cst_14 = arith.constant dense<0.000000e+00> : vector<8x32xf32>
    %19 = tpu.matmul %17, %18, %cst_14 {dimension_numbers = #tpu.dot_dimension_numbers<[1], [0], [0], [1], [0, 0, 1, 1], [], []>} : vector<8x64xbf16>, vector<64x32xbf16>, vector<8x32xf32> -> vector<8x32xf32>
    %c0_15 = arith.constant 0 : index
    %c0_16 = arith.constant 0 : index
    %20 = vector.load %arg7[%c0_15, %c0_16] : memref<1x32xf32, #tpu.memory_space<vmem>>, vector<1x32xf32>
    %21 = vector.broadcast %20 : vector<1x32xf32> to vector<8x32xf32>
    %22 = arith.addf %19, %21 : vector<8x32xf32>
    %cst_17 = arith.constant 0.000000e+00 : f32
    %23 = vector.broadcast %cst_17 : f32 to vector<8x32xf32>
    %24 = arith.maximumf %22, %23 : vector<8x32xf32>
    %25 = arith.truncf %24 : vector<8x32xf32> to vector<8x32xbf16>
    %c0_18 = arith.constant 0 : index
    %c0_19 = arith.constant 0 : index
    %26 = vector.load %arg8[%c0_18, %c0_19] : memref<32x32xbf16, #tpu.memory_space<vmem>>, vector<32x32xbf16>
    %cst_20 = arith.constant dense<0.000000e+00> : vector<8x32xf32>
    %27 = tpu.matmul %25, %26, %cst_20 {dimension_numbers = #tpu.dot_dimension_numbers<[1], [0], [0], [1], [0, 0, 1, 1], [], []>} : vector<8x32xbf16>, vector<32x32xbf16>, vector<8x32xf32> -> vector<8x32xf32>
    %c0_21 = arith.constant 0 : index
    %c0_22 = arith.constant 0 : index
    %28 = vector.load %arg9[%c0_21, %c0_22] : memref<1x32xf32, #tpu.memory_space<vmem>>, vector<1x32xf32>
    %29 = vector.broadcast %28 : vector<1x32xf32> to vector<8x32xf32>
    %30 = arith.addf %27, %29 : vector<8x32xf32>
    %cst_23 = arith.constant 0.000000e+00 : f32
    %31 = vector.broadcast %cst_23 : f32 to vector<8x32xf32>
    %32 = arith.maximumf %30, %31 : vector<8x32xf32>
    %33 = arith.truncf %32 : vector<8x32xf32> to vector<8x32xbf16>
    %c0_24 = arith.constant 0 : index
    %c0_25 = arith.constant 0 : index
    %34 = vector.load %arg10[%c0_24, %c0_25] : memref<32x64xbf16, #tpu.memory_space<vmem>>, vector<32x64xbf16>
    %cst_26 = arith.constant dense<0.000000e+00> : vector<8x64xf32>
    %35 = tpu.matmul %33, %34, %cst_26 {dimension_numbers = #tpu.dot_dimension_numbers<[1], [0], [0], [1], [0, 0, 1, 1], [], []>} : vector<8x32xbf16>, vector<32x64xbf16>, vector<8x64xf32> -> vector<8x64xf32>
    %c0_27 = arith.constant 0 : index
    %c0_28 = arith.constant 0 : index
    %36 = vector.load %arg11[%c0_27, %c0_28] : memref<1x64xf32, #tpu.memory_space<vmem>>, vector<1x64xf32>
    %37 = vector.broadcast %36 : vector<1x64xf32> to vector<8x64xf32>
    %38 = arith.addf %35, %37 : vector<8x64xf32>
    %cst_29 = arith.constant 0.000000e+00 : f32
    %39 = vector.broadcast %cst_29 : f32 to vector<8x64xf32>
    %40 = arith.maximumf %38, %39 : vector<8x64xf32>
    %41 = arith.truncf %40 : vector<8x64xf32> to vector<8x64xbf16>
    %c0_30 = arith.constant 0 : index
    %c0_31 = arith.constant 0 : index
    %42 = vector.load %arg12[%c0_30, %c0_31] : memref<64x128xbf16, #tpu.memory_space<vmem>>, vector<64x128xbf16>
    %cst_32 = arith.constant dense<0.000000e+00> : vector<8x128xf32>
    %43 = tpu.matmul %41, %42, %cst_32 {dimension_numbers = #tpu.dot_dimension_numbers<[1], [0], [0], [1], [0, 0, 1, 1], [], []>} : vector<8x64xbf16>, vector<64x128xbf16>, vector<8x128xf32> -> vector<8x128xf32>
    %c0_33 = arith.constant 0 : index
    %c0_34 = arith.constant 0 : index
    %44 = vector.load %arg13[%c0_33, %c0_34] : memref<1x128xf32, #tpu.memory_space<vmem>>, vector<1x128xf32>
    %45 = vector.broadcast %44 : vector<1x128xf32> to vector<8x128xf32>
    %46 = arith.addf %43, %45 : vector<8x128xf32>
    %cst_35 = arith.constant 0.000000e+00 : f32
    %47 = vector.broadcast %cst_35 : f32 to vector<8x128xf32>
    %48 = arith.maximumf %46, %47 : vector<8x128xf32>
    %49 = arith.truncf %48 : vector<8x128xf32> to vector<8x128xbf16>
    %c0_36 = arith.constant 0 : index
    %c0_37 = arith.constant 0 : index
    %50 = vector.load %arg14[%c0_36, %c0_37] : memref<128x784xbf16, #tpu.memory_space<vmem>>, vector<128x784xbf16>
    %cst_38 = arith.constant dense<0.000000e+00> : vector<8x784xf32>
    %51 = tpu.matmul %49, %50, %cst_38 {dimension_numbers = #tpu.dot_dimension_numbers<[1], [0], [0], [1], [0, 0, 1, 1], [], []>} : vector<8x128xbf16>, vector<128x784xbf16>, vector<8x784xf32> -> vector<8x784xf32>
    %c0_39 = arith.constant 0 : index
    %c0_40 = arith.constant 0 : index
    %52 = vector.load %arg15[%c0_39, %c0_40] : memref<1x784xf32, #tpu.memory_space<vmem>>, vector<1x784xf32>
    %53 = vector.broadcast %52 : vector<1x784xf32> to vector<8x784xf32>
    %54 = arith.addf %51, %53 : vector<8x784xf32>
    %55 = math.tanh %54 : vector<8x784xf32>
    %c0_41 = arith.constant 0 : index
    %c0_42 = arith.constant 0 : index
    %56 = vector.load %arg16[%c0_41, %c0_42] : memref<8x784xf32, #tpu.memory_space<vmem>>, vector<8x784xf32>
    tpu.vector_store %arg16[%c0_41, %c0_42], %55 {strides = array<i32>} : memref<8x784xf32, #tpu.memory_space<vmem>>, vector<8x784xf32>,
    return
  }
  func.func @transform_0(%arg0: i32) -> (i32, i32) {
    %c0_i32 = arith.constant 0 : i32
    %c0_i32_0 = arith.constant 0 : i32
    return %arg0, %c0_i32 : i32, i32
  }
  func.func @transform_1(%arg0: i32) -> (i32, i32) {
    %c0_i32 = arith.constant 0 : i32
    %c0_i32_0 = arith.constant 0 : i32
    %c0_i32_1 = arith.constant 0 : i32
    return %c0_i32, %c0_i32_0 : i32, i32
  }
  func.func @transform_2(%arg0: i32) -> (i32, i32) {
    %c0_i32 = arith.constant 0 : i32
    %c0_i32_0 = arith.constant 0 : i32
    %c0_i32_1 = arith.constant 0 : i32
    return %c0_i32, %c0_i32_0 : i32, i32
  }
  func.func @transform_3(%arg0: i32) -> (i32, i32) {
    %c0_i32 = arith.constant 0 : i32
    %c0_i32_0 = arith.constant 0 : i32
    %c0_i32_1 = arith.constant 0 : i32
    return %c0_i32, %c0_i32_0 : i32, i32
  }
  func.func @transform_4(%arg0: i32) -> (i32, i32) {
    %c0_i32 = arith.constant 0 : i32
    %c0_i32_0 = arith.constant 0 : i32
    %c0_i32_1 = arith.constant 0 : i32
    return %c0_i32, %c0_i32_0 : i32, i32
  }
  func.func @transform_5(%arg0: i32) -> (i32, i32) {
    %c0_i32 = arith.constant 0 : i32
    %c0_i32_0 = arith.constant 0 : i32
    %c0_i32_1 = arith.constant 0 : i32
    return %c0_i32, %c0_i32_0 : i32, i32
  }
  func.func @transform_6(%arg0: i32) -> (i32, i32) {
    %c0_i32 = arith.constant 0 : i32
    %c0_i32_0 = arith.constant 0 : i32
    %c0_i32_1 = arith.constant 0 : i32
    return %c0_i32, %c0_i32_0 : i32, i32
  }
  func.func @transform_7(%arg0: i32) -> (i32, i32) {
    %c0_i32 = arith.constant 0 : i32
    %c0_i32_0 = arith.constant 0 : i32
    %c0_i32_1 = arith.constant 0 : i32
    return %c0_i32, %c0_i32_0 : i32, i32
  }
  func.func @transform_8(%arg0: i32) -> (i32, i32) {
    %c0_i32 = arith.constant 0 : i32
    %c0_i32_0 = arith.constant 0 : i32
    %c0_i32_1 = arith.constant 0 : i32
    return %c0_i32, %c0_i32_0 : i32, i32
  }
  func.func @transform_9(%arg0: i32) -> (i32, i32) {
    %c0_i32 = arith.constant 0 : i32
    %c0_i32_0 = arith.constant 0 : i32
    %c0_i32_1 = arith.constant 0 : i32
    return %c0_i32, %c0_i32_0 : i32, i32
  }
  func.func @transform_10(%arg0: i32) -> (i32, i32) {
    %c0_i32 = arith.constant 0 : i32
    %c0_i32_0 = arith.constant 0 : i32
    %c0_i32_1 = arith.constant 0 : i32
    return %c0_i32, %c0_i32_0 : i32, i32
  }
  func.func @transform_11(%arg0: i32) -> (i32, i32) {
    %c0_i32 = arith.constant 0 : i32
    %c0_i32_0 = arith.constant 0 : i32
    %c0_i32_1 = arith.constant 0 : i32
    return %c0_i32, %c0_i32_0 : i32, i32
  }
  func.func @transform_12(%arg0: i32) -> (i32, i32) {
    %c0_i32 = arith.constant 0 : i32
    %c0_i32_0 = arith.constant 0 : i32
    %c0_i32_1 = arith.constant 0 : i32
    return %c0_i32, %c0_i32_0 : i32, i32
  }
  func.func @transform_13(%arg0: i32) -> (i32, i32) {
    %c0_i32 = arith.constant 0 : i32
    %c0_i32_0 = arith.constant 0 : i32
    %c0_i32_1 = arith.constant 0 : i32
    return %c0_i32, %c0_i32_0 : i32, i32
  }
  func.func @transform_14(%arg0: i32) -> (i32, i32) {
    %c0_i32 = arith.constant 0 : i32
    %c0_i32_0 = arith.constant 0 : i32
    %c0_i32_1 = arith.constant 0 : i32
    return %c0_i32, %c0_i32_0 : i32, i32
  }
  func.func @transform_15(%arg0: i32) -> (i32, i32) {
    %c0_i32 = arith.constant 0 : i32
    %c0_i32_0 = arith.constant 0 : i32
    return %arg0, %c0_i32 : i32, i32
  }
}

module attributes {stable_mosaic.version = 11 : i64} {
  func.func @_mlp_kernel(%arg0: i32, %arg1: memref<8x784xf32, #tpu.memory_space<vmem>>, %arg2: memref<784x128xbf16, #tpu.memory_space<vmem>>, %arg3: memref<1x128xf32, #tpu.memory_space<vmem>>, %arg4: memref<128x64xbf16, #tpu.memory_space<vmem>>, %arg5: memref<1x64xf32, #tpu.memory_space<vmem>>, %arg6: memref<64x32xbf16, #tpu.memory_space<vmem>>, %arg7: memref<1x32xf32, #tpu.memory_space<vmem>>, %arg8: memref<32x32xbf16, #tpu.memory_space<vmem>>, %arg9: memref<1x32xf32, #tpu.memory_space<vmem>>, %arg10: memref<32x64xbf16, #tpu.memory_space<vmem>>, %arg11: memref<1x64xf32, #tpu.memory_space<vmem>>, %arg12: memref<64x128xbf16, #tpu.memory_space<vmem>>, %arg13: memref<1x128xf32, #tpu.memory_space<vmem>>, %arg14: memref<128x784xbf16, #tpu.memory_space<vmem>>, %arg15: memref<1x784xf32, #tpu.memory_space<vmem>>, %arg16: memref<8x784xf32, #tpu.memory_space<vmem>>) attributes {dimension_semantics = [#tpu.dimension_semantics<parallel>], iteration_bounds = array<i64: 1>, scalar_prefetch = 0 : i64, scratch_operands = 0 : i64, tpu.core_type = #tpu.core_type<tc>, window_params = [{transform_indices = @transform_0, window_bounds = array<i64: 8, 784>}, {pipeline_mode = #tpu.pipeline_mode<synchronous>, transform_indices = @transform_1, window_bounds = array<i64: 784, 128>}, {pipeline_mode = #tpu.pipeline_mode<synchronous>, transform_indices = @transform_2, window_bounds = array<i64: 1, 128>}, {pipeline_mode = #tpu.pipeline_mode<synchronous>, transform_indices = @transform_3, window_bounds = array<i64: 128, 64>}, {pipeline_mode = #tpu.pipeline_mode<synchronous>, transform_indices = @transform_4, window_bounds = array<i64: 1, 64>}, {pipeline_mode = #tpu.pipeline_mode<synchronous>, transform_indices = @transform_5, window_bounds = array<i64: 64, 32>}, {pipeline_mode = #tpu.pipeline_mode<synchronous>, transform_indices = @transform_6, window_bounds = array<i64: 1, 32>}, {pipeline_mode = #tpu.pipeline_mode<synchronous>, transform_indices = @transform_7, window_bounds = array<i64: 32, 32>}, {pipeline_mode = #tpu.pipeline_mode<synchronous>, transform_indices = @transform_8, window_bounds = array<i64: 1, 32>}, {pipeline_mode = #tpu.pipeline_mode<synchronous>, transform_indices = @transform_9, window_bounds = array<i64: 32, 64>}, {pipeline_mode = #tpu.pipeline_mode<synchronous>, transform_indices = @transform_10, window_bounds = array<i64: 1, 64>}, {pipeline_mode = #tpu.pipeline_mode<synchronous>, transform_indices = @transform_11, window_bounds = array<i64: 64, 128>}, {pipeline_mode = #tpu.pipeline_mode<synchronous>, transform_indices = @transform_12, window_bounds = array<i64: 1, 128>}, {pipeline_mode = #tpu.pipeline_mode<synchronous>, transform_indices = @transform_13, window_bounds = array<i64: 128, 784>}, {pipeline_mode = #tpu.pipeline_mode<synchronous>, transform_indices = @transform_14, window_bounds = array<i64: 1, 784>}, {transform_indices = @transform_15, window_bounds = array<i64: 8, 784>}]} {
    %c0 = arith.constant 0 : index
    %c0_0 = arith.constant 0 : index
    %0 = vector.load %arg1[%c0, %c0_0] : memref<8x784xf32, #tpu.memory_space<vmem>>, vector<8x784xf32>
    %1 = arith.truncf %0 : vector<8x784xf32> to vector<8x784xbf16>
    %c0_1 = arith.constant 0 : index
    %c0_2 = arith.constant 0 : index
    %2 = vector.load %arg2[%c0_1, %c0_2] : memref<784x128xbf16, #tpu.memory_space<vmem>>, vector<784x128xbf16>
    %cst = arith.constant dense<0.000000e+00> : vector<8x128xf32>
    %3 = tpu.matmul %1, %2, %cst {dimension_numbers = #tpu.dot_dimension_numbers<[1], [0], [0], [1], [0, 0, 1, 1], [], []>} : vector<8x784xbf16>, vector<784x128xbf16>, vector<8x128xf32> -> vector<8x128xf32>
    %c0_3 = arith.constant 0 : index
    %c0_4 = arith.constant 0 : index
    %4 = vector.load %arg3[%c0_3, %c0_4] : memref<1x128xf32, #tpu.memory_space<vmem>>, vector<1x128xf32>
    %5 = vector.broadcast %4 : vector<1x128xf32> to vector<8x128xf32>
    %6 = arith.addf %3, %5 : vector<8x128xf32>
    %cst_5 = arith.constant 0.000000e+00 : f32
    %7 = vector.broadcast %cst_5 : f32 to vector<8x128xf32>
    %8 = arith.maximumf %6, %7 : vector<8x128xf32>
    %9 = arith.truncf %8 : vector<8x128xf32> to vector<8x128xbf16>
    %c0_6 = arith.constant 0 : index
    %c0_7 = arith.constant 0 : index
    %10 = vector.load %arg4[%c0_6, %c0_7] : memref<128x64xbf16, #tpu.memory_space<vmem>>, vector<128x64xbf16>
    %cst_8 = arith.constant dense<0.000000e+00> : vector<8x64xf32>
    %11 = tpu.matmul %9, %10, %cst_8 {dimension_numbers = #tpu.dot_dimension_numbers<[1], [0], [0], [1], [0, 0, 1, 1], [], []>} : vector<8x128xbf16>, vector<128x64xbf16>, vector<8x64xf32> -> vector<8x64xf32>
    %c0_9 = arith.constant 0 : index
    %c0_10 = arith.constant 0 : index
    %12 = vector.load %arg5[%c0_9, %c0_10] : memref<1x64xf32, #tpu.memory_space<vmem>>, vector<1x64xf32>
    %13 = vector.broadcast %12 : vector<1x64xf32> to vector<8x64xf32>
    %14 = arith.addf %11, %13 : vector<8x64xf32>
    %cst_11 = arith.constant 0.000000e+00 : f32
    %15 = vector.broadcast %cst_11 : f32 to vector<8x64xf32>
    %16 = arith.maximumf %14, %15 : vector<8x64xf32>
    %17 = arith.truncf %16 : vector<8x64xf32> to vector<8x64xbf16>
    %c0_12 = arith.constant 0 : index
    %c0_13 = arith.constant 0 : index
    %18 = vector.load %arg6[%c0_12, %c0_13] : memref<64x32xbf16, #tpu.memory_space<vmem>>, vector<64x32xbf16>
    %cst_14 = arith.constant dense<0.000000e+00> : vector<8x32xf32>
    %19 = tpu.matmul %17, %18, %cst_14 {dimension_numbers = #tpu.dot_dimension_numbers<[1], [0], [0], [1], [0, 0, 1, 1], [], []>} : vector<8x64xbf16>, vector<64x32xbf16>, vector<8x32xf32> -> vector<8x32xf32>
    %c0_15 = arith.constant 0 : index
    %c0_16 = arith.constant 0 : index
    %20 = vector.load %arg7[%c0_15, %c0_16] : memref<1x32xf32, #tpu.memory_space<vmem>>, vector<1x32xf32>
    %21 = vector.broadcast %20 : vector<1x32xf32> to vector<8x32xf32>
    %22 = arith.addf %19, %21 : vector<8x32xf32>
    %cst_17 = arith.constant 0.000000e+00 : f32
    %23 = vector.broadcast %cst_17 : f32 to vector<8x32xf32>
    %24 = arith.maximumf %22, %23 : vector<8x32xf32>
    %25 = arith.truncf %24 : vector<8x32xf32> to vector<8x32xbf16>
    %c0_18 = arith.constant 0 : index
    %c0_19 = arith.constant 0 : index
    %26 = vector.load %arg8[%c0_18, %c0_19] : memref<32x32xbf16, #tpu.memory_space<vmem>>, vector<32x32xbf16>
    %cst_20 = arith.constant dense<0.000000e+00> : vector<8x32xf32>
    %27 = tpu.matmul %25, %26, %cst_20 {dimension_numbers = #tpu.dot_dimension_numbers<[1], [0], [0], [1], [0, 0, 1, 1], [], []>} : vector<8x32xbf16>, vector<32x32xbf16>, vector<8x32xf32> -> vector<8x32xf32>
    %c0_21 = arith.constant 0 : index
    %c0_22 = arith.constant 0 : index
    %28 = vector.load %arg9[%c0_21, %c0_22] : memref<1x32xf32, #tpu.memory_space<vmem>>, vector<1x32xf32>
    %29 = vector.broadcast %28 : vector<1x32xf32> to vector<8x32xf32>
    %30 = arith.addf %27, %29 : vector<8x32xf32>
    %cst_23 = arith.constant 0.000000e+00 : f32
    %31 = vector.broadcast %cst_23 : f32 to vector<8x32xf32>
    %32 = arith.maximumf %30, %31 : vector<8x32xf32>
    %33 = arith.truncf %32 : vector<8x32xf32> to vector<8x32xbf16>
    %c0_24 = arith.constant 0 : index
    %c0_25 = arith.constant 0 : index
    %34 = vector.load %arg10[%c0_24, %c0_25] : memref<32x64xbf16, #tpu.memory_space<vmem>>, vector<32x64xbf16>
    %cst_26 = arith.constant dense<0.000000e+00> : vector<8x64xf32>
    %35 = tpu.matmul %33, %34, %cst_26 {dimension_numbers = #tpu.dot_dimension_numbers<[1], [0], [0], [1], [0, 0, 1, 1], [], []>} : vector<8x32xbf16>, vector<32x64xbf16>, vector<8x64xf32> -> vector<8x64xf32>
    %c0_27 = arith.constant 0 : index
    %c0_28 = arith.constant 0 : index
    %36 = vector.load %arg11[%c0_27, %c0_28] : memref<1x64xf32, #tpu.memory_space<vmem>>, vector<1x64xf32>
    %37 = vector.broadcast %36 : vector<1x64xf32> to vector<8x64xf32>
    %38 = arith.addf %35, %37 : vector<8x64xf32>
    %cst_29 = arith.constant 0.000000e+00 : f32
    %39 = vector.broadcast %cst_29 : f32 to vector<8x64xf32>
    %40 = arith.maximumf %38, %39 : vector<8x64xf32>
    %41 = arith.truncf %40 : vector<8x64xf32> to vector<8x64xbf16>
    %c0_30 = arith.constant 0 : index
    %c0_31 = arith.constant 0 : index
    %42 = vector.load %arg12[%c0_30, %c0_31] : memref<64x128xbf16, #tpu.memory_space<vmem>>, vector<64x128xbf16>
    %cst_32 = arith.constant dense<0.000000e+00> : vector<8x128xf32>
    %43 = tpu.matmul %41, %42, %cst_32 {dimension_numbers = #tpu.dot_dimension_numbers<[1], [0], [0], [1], [0, 0, 1, 1], [], []>} : vector<8x64xbf16>, vector<64x128xbf16>, vector<8x128xf32> -> vector<8x128xf32>
    %c0_33 = arith.constant 0 : index
    %c0_34 = arith.constant 0 : index
    %44 = vector.load %arg13[%c0_33, %c0_34] : memref<1x128xf32, #tpu.memory_space<vmem>>, vector<1x128xf32>
    %45 = vector.broadcast %44 : vector<1x128xf32> to vector<8x128xf32>
    %46 = arith.addf %43, %45 : vector<8x128xf32>
    %cst_35 = arith.constant 0.000000e+00 : f32
    %47 = vector.broadcast %cst_35 : f32 to vector<8x128xf32>
    %48 = arith.maximumf %46, %47 : vector<8x128xf32>
    %49 = arith.truncf %48 : vector<8x128xf32> to vector<8x128xbf16>
    %c0_36 = arith.constant 0 : index
    %c0_37 = arith.constant 0 : index
    %50 = vector.load %arg14[%c0_36, %c0_37] : memref<128x784xbf16, #tpu.memory_space<vmem>>, vector<128x784xbf16>
    %cst_38 = arith.constant dense<0.000000e+00> : vector<8x784xf32>
    %51 = tpu.matmul %49, %50, %cst_38 {dimension_numbers = #tpu.dot_dimension_numbers<[1], [0], [0], [1], [0, 0, 1, 1], [], []>} : vector<8x128xbf16>, vector<128x784xbf16>, vector<8x784xf32> -> vector<8x784xf32>
    %c0_39 = arith.constant 0 : index
    %c0_40 = arith.constant 0 : index
    %52 = vector.load %arg15[%c0_39, %c0_40] : memref<1x784xf32, #tpu.memory_space<vmem>>, vector<1x784xf32>
    %53 = vector.broadcast %52 : vector<1x784xf32> to vector<8x784xf32>
    %54 = arith.addf %51, %53 : vector<8x784xf32>
    %55 = math.tanh %54 : vector<8x784xf32>
    %c0_41 = arith.constant 0 : index
    %c0_42 = arith.constant 0 : index
    %56 = vector.load %arg16[%c0_41, %c0_42] : memref<8x784xf32, #tpu.memory_space<vmem>>, vector<8x784xf32>
    tpu.vector_store %arg16[%c0_41, %c0_42], %55 {strides = array<i32>} : memref<8x784xf32, #tpu.memory_space<vmem>>, vector<8x784xf32>,
    return
  }
  func.func @transform_0(%arg0: i32) -> (i32, i32) {
    %c0_i32 = arith.constant 0 : i32
    %c0_i32_0 = arith.constant 0 : i32
    return %arg0, %c0_i32 : i32, i32
  }
  func.func @transform_1(%arg0: i32) -> (i32, i32) {
    %c0_i32 = arith.constant 0 : i32
    %c0_i32_0 = arith.constant 0 : i32
    %c0_i32_1 = arith.constant 0 : i32
    return %c0_i32, %c0_i32_0 : i32, i32
  }
  func.func @transform_2(%arg0: i32) -> (i32, i32) {
    %c0_i32 = arith.constant 0 : i32
    %c0_i32_0 = arith.constant 0 : i32
    %c0_i32_1 = arith.constant 0 : i32
    return %c0_i32, %c0_i32_0 : i32, i32
  }
  func.func @transform_3(%arg0: i32) -> (i32, i32) {
    %c0_i32 = arith.constant 0 : i32
    %c0_i32_0 = arith.constant 0 : i32
    %c0_i32_1 = arith.constant 0 : i32
    return %c0_i32, %c0_i32_0 : i32, i32
  }
  func.func @transform_4(%arg0: i32) -> (i32, i32) {
    %c0_i32 = arith.constant 0 : i32
    %c0_i32_0 = arith.constant 0 : i32
    %c0_i32_1 = arith.constant 0 : i32
    return %c0_i32, %c0_i32_0 : i32, i32
  }
  func.func @transform_5(%arg0: i32) -> (i32, i32) {
    %c0_i32 = arith.constant 0 : i32
    %c0_i32_0 = arith.constant 0 : i32
    %c0_i32_1 = arith.constant 0 : i32
    return %c0_i32, %c0_i32_0 : i32, i32
  }
  func.func @transform_6(%arg0: i32) -> (i32, i32) {
    %c0_i32 = arith.constant 0 : i32
    %c0_i32_0 = arith.constant 0 : i32
    %c0_i32_1 = arith.constant 0 : i32
    return %c0_i32, %c0_i32_0 : i32, i32
  }
  func.func @transform_7(%arg0: i32) -> (i32, i32) {
    %c0_i32 = arith.constant 0 : i32
    %c0_i32_0 = arith.constant 0 : i32
    %c0_i32_1 = arith.constant 0 : i32
    return %c0_i32, %c0_i32_0 : i32, i32
  }
  func.func @transform_8(%arg0: i32) -> (i32, i32) {
    %c0_i32 = arith.constant 0 : i32
    %c0_i32_0 = arith.constant 0 : i32
    %c0_i32_1 = arith.constant 0 : i32
    return %c0_i32, %c0_i32_0 : i32, i32
  }
  func.func @transform_9(%arg0: i32) -> (i32, i32) {
    %c0_i32 = arith.constant 0 : i32
    %c0_i32_0 = arith.constant 0 : i32
    %c0_i32_1 = arith.constant 0 : i32
    return %c0_i32, %c0_i32_0 : i32, i32
  }
  func.func @transform_10(%arg0: i32) -> (i32, i32) {
    %c0_i32 = arith.constant 0 : i32
    %c0_i32_0 = arith.constant 0 : i32
    %c0_i32_1 = arith.constant 0 : i32
    return %c0_i32, %c0_i32_0 : i32, i32
  }
  func.func @transform_11(%arg0: i32) -> (i32, i32) {
    %c0_i32 = arith.constant 0 : i32
    %c0_i32_0 = arith.constant 0 : i32
    %c0_i32_1 = arith.constant 0 : i32
    return %c0_i32, %c0_i32_0 : i32, i32
  }
  func.func @transform_12(%arg0: i32) -> (i32, i32) {
    %c0_i32 = arith.constant 0 : i32
    %c0_i32_0 = arith.constant 0 : i32
    %c0_i32_1 = arith.constant 0 : i32
    return %c0_i32, %c0_i32_0 : i32, i32
  }
  func.func @transform_13(%arg0: i32) -> (i32, i32) {
    %c0_i32 = arith.constant 0 : i32
    %c0_i32_0 = arith.constant 0 : i32
    %c0_i32_1 = arith.constant 0 : i32
    return %c0_i32, %c0_i32_0 : i32, i32
  }
  func.func @transform_14(%arg0: i32) -> (i32, i32) {
    %c0_i32 = arith.constant 0 : i32
    %c0_i32_0 = arith.constant 0 : i32
    %c0_i32_1 = arith.constant 0 : i32
    return %c0_i32, %c0_i32_0 : i32, i32
  }
  func.func @transform_15(%arg0: i32) -> (i32, i32) {
    %c0_i32 = arith.constant 0 : i32
    %c0_i32_0 = arith.constant 0 : i32
    return %arg0, %c0_i32 : i32, i32
  }
}

</mosaic_0001>

<bundles_post_ra>
// kernel: tpu_custom_call.1
= control target key start
LH: loop header
LB: loop body
LE: loop exit
PB: predicated region body
PF: predicated region fallthrough
CT: control target
= control target key end

     0   :  { %v2145_v44 = vmov 0.0   ;;  %vm2146_vm0 = vmmov 0   ;;  %vm465_vm1 = vcmask 130048   ;;  %s2707_s0 = inlined_call_operand.vmem [shape: f32[8,784], index: 0, kind: input, shape index: {}]   ;;  %s2708_s1 = inlined_call_operand.vmem [shape: bf16[784,128], index: 1, kind: input, shape index: {}]   ;;  %s2709_s2 = inlined_call_operand.vmem [shape: f32[1,128], index: 2, kind: input, shape index: {}]   ;;  %s2710_s3 = inlined_call_operand.vmem [shape: bf16[128,64], index: 3, kind: input, shape index: {}]   ;;  %s2711_s4 = inlined_call_operand.vmem [shape: f32[1,64], index: 4, kind: input, shape index: {}]   ;;  %s2712_s5 = inlined_call_operand.vmem [shape: bf16[64,32], index: 5, kind: input, shape index: {}]   ;;  %s2713_s6 = inlined_call_operand.vmem [shape: f32[1,32], index: 6, kind: input, shape index: {}]   ;;  %s2714_s7 = inlined_call_operand.vmem [shape: bf16[32,32], index: 7, kind: input, shape index: {}]   ;;  %s2715_s8 = inlined_call_operand.vmem [shape: f32[1,32], index: 8, kind: input, shape index: {}]   ;;  %s2716_s9 = inlined_call_operand.vmem [shape: bf16[32,64], index: 9, kind: input, shape index: {}]   ;;  %s2717_s10 = inlined_call_operand.vmem [shape: f32[1,64], index: 10, kind: input, shape index: {}]   ;;  %s2718_s11 = inlined_call_operand.vmem [shape: bf16[64,128], index: 11, kind: input, shape index: {}]   ;;  %s2719_s12 = inlined_call_operand.vmem [shape: f32[1,128], index: 12, kind: input, shape index: {}]   ;;  %s2720_s13 = inlined_call_operand.vmem [shape: bf16[128,784], index: 13, kind: input, shape index: {}]   ;;  %s2721_s14 = inlined_call_operand.vmem [shape: f32[1,784], index: 14, kind: input, shape index: {}]   ;;  %s2722_s15 = inlined_call_operand.hbm [shape: f32[8,784], index: 15, kind: output, shape index: {}]  }
   0x1   :  { %v1958_v0 = vld [vmem:[%s2708_s1 + $0x40] sm:$0xff]   ;;  %v1962_v4 = vld [vmem:[%s2708_s1 + $0x48] sm:$0xff]   ;;  %v1966_v8 = vld [vmem:[%s2708_s1 + $0x50] sm:$0xff]  }
   0x2   :  { %v1959_v1 = vld [vmem:[%s2708_s1] sm:$0xff]   ;;  %1766 = vmatprep.subr.bf16.mxu0 %v1958_v0  ;;  %v1963_v5 = vld [vmem:[%s2708_s1 + $0x8] sm:$0xff]   ;;  %v1967_v9 = vld [vmem:[%s2708_s1 + $0x10] sm:$0xff]  }
   0x3   :  { %v1960_v2 = vld [vmem:[%s2708_s1 + $0xc0] sm:$0xff]   ;;  %1767 = vmatpush3.bf16.msra.mxu0 %v1959_v1  ;;  %v1964_v6 = vld [vmem:[%s2708_s1 + $0xc8] sm:$0xff]   ;;  %v1968_v10 = vld [vmem:[%s2708_s1 + $0xd0] sm:$0xff]  }
   0x4   :  { %v1961_v3 = vld [vmem:[%s2708_s1 + $0x80] sm:$0xff]   ;;  %1788 = vmatprep.subr.bf16.mxu1 %v1960_v2  ;;  %1768 = vmatprep.subr.bf16.mxu0 %v1962_v4  ;;  %v1965_v7 = vld [vmem:[%s2708_s1 + $0x88] sm:$0xff]   ;;  %v1969_v11 = vld [vmem:[%s2708_s1 + $0x90] sm:$0xff]  }
   0x5   :  { %1789 = vmatpush3.bf16.msra.mxu1 %v1961_v3  ;;  %v1970_v12 = vld [vmem:[%s2708_s1 + $0x58] sm:$0xff]   ;;  %v1974_v16 = vld [vmem:[%s2708_s1 + $0x60] sm:$0xff]   ;;  %v1978_v20 = vld [vmem:[%s2708_s1 + $0x68] sm:$0xff]  }
   0x6   :  { %1790 = vmatprep.subr.bf16.mxu1 %v1964_v6  ;;  %v1971_v13 = vld [vmem:[%s2708_s1 + $0x18] sm:$0xff]   ;;  %v1975_v17 = vld [vmem:[%s2708_s1 + $0x20] sm:$0xff]   ;;  %v1979_v21 = vld [vmem:[%s2708_s1 + $0x28] sm:$0xff]  }
   0x7   :  { %1769 = vmatpush3.bf16.msra.mxu0 %v1963_v5  ;;  %v1972_v14 = vld [vmem:[%s2708_s1 + $0xd8] sm:$0xff]   ;;  %v1976_v18 = vld [vmem:[%s2708_s1 + $0xe0] sm:$0xff]   ;;  %v1980_v22 = vld [vmem:[%s2708_s1 + $0xe8] sm:$0xff]  }
   0x8   :  { %1770 = vmatprep.subr.bf16.mxu0 %v1966_v8  ;;  %v1973_v15 = vld [vmem:[%s2708_s1 + $0x98] sm:$0xff]   ;;  %v1977_v19 = vld [vmem:[%s2708_s1 + $0xa0] sm:$0xff]   ;;  %v1981_v23 = vld [vmem:[%s2708_s1 + $0xa8] sm:$0xff]  }
   0x9   :  { %1791 = vmatpush3.bf16.msra.mxu1 %v1965_v7  ;;  %v1982_v24 = vld [vmem:[%s2708_s1 + $0x70] sm:$0xff]   ;;  %v1986_v28 = vld [vmem:[%s2708_s1 + $0x78] sm:$0xff]   ;;  %v53_v31 = vld [vmem:[%s2707_s0 + $0x8] sm:$0xff] }
   0xa   :  { %1792 = vmatprep.subr.bf16.mxu1 %v1968_v10  ;;  %v1983_v25 = vld [vmem:[%s2708_s1 + $0x30] sm:$0xff]   ;;  %v1987_v29 = vld [vmem:[%s2708_s1 + $0x38] sm:$0xff]   ;;  %v60_v32 = vpack.c.bf16 %v53_v31, %v53_v31  ;;  %v52_v34 = vld [vmem:[%s2707_s0] sm:$0xff] }
   0xb   :  { %1771 = vmatpush3.bf16.msra.mxu0 %v1967_v9  ;;  %v1984_v26 = vld [vmem:[%s2708_s1 + $0xf0] sm:$0xff]   ;;  %v1988_v30 = vld [vmem:[%s2708_s1 + $0xf8] sm:$0xff]   ;;  %v59_v35 = vpack.c.bf16 %v52_v34, %v52_v34  ;;  %v1990_v36 = vld [vmem:[%s2708_s1 + $0x140] sm:$0xff]  }
   0xc   :  { %1772 = vmatprep.subr.bf16.mxu0 %v1970_v12  ;;  %v1985_v27 = vld [vmem:[%s2708_s1 + $0xb0] sm:$0xff]   ;;  %v1989_v33 = vld [vmem:[%s2708_s1 + $0xb8] sm:$0xff]   ;;  %501 = vmatprep.mubr.bf16.mxu0 %v60_v32  ;;  %v1991_v39 = vld [vmem:[%s2708_s1 + $0x100] sm:$0xff]  }
   0xd   :  { %1793 = vmatpush3.bf16.msra.mxu1 %v1969_v11  ;;  %v55_v37 = vld [vmem:[%s2707_s0 + $0x18] sm:$0xff]  ;;  %v54_v40 = vld [vmem:[%s2707_s0 + $0x10] sm:$0xff]  ;;  %v1992_v42 = vld [vmem:[%s2708_s1 + $0x148] sm:$0xff]  }
   0xe   :  { %1794 = vmatprep.subr.bf16.mxu1 %v1972_v14  ;;  %v62_v38 = vpack.c.bf16 %v55_v37, %v55_v37  ;;  %v61_v41 = vpack.c.bf16 %v54_v40, %v54_v40  ;;  %v1993_v43 = vld [vmem:[%s2708_s1 + $0x108] sm:$0xff]   ;;  %v1994_v45 = vld [vmem:[%s2708_s1 + $0x150] sm:$0xff]   ;;  %v1996_v47 = vld [vmem:[%s2708_s1 + $0x158] sm:$0xff]  }
   0xf   :  { %1773 = vmatpush3.bf16.msra.mxu0 %v1971_v13  ;;  %v1995_v46 = vld [vmem:[%s2708_s1 + $0x110] sm:$0xff]   ;;  %v1997_v48 = vld [vmem:[%s2708_s1 + $0x118] sm:$0xff]   ;;  %v1998_v49 = vld [vmem:[%s2708_s1 + $0x160] sm:$0xff]  }
  0x10   :  { %1774 = vmatprep.subr.bf16.mxu0 %v1974_v16  ;;  %541 = vmatprep.mubr.bf16.mxu1 %v62_v38  ;;  %v1999_v50 = vld [vmem:[%s2708_s1 + $0x120] sm:$0xff]   ;;  %v2000_v51 = vld [vmem:[%s2708_s1 + $0x168] sm:$0xff]   ;;  %v2002_v55 = vld [vmem:[%s2708_s1 + $0x170] sm:$0xff]  }
  0x11   :  { %1795 = vmatpush3.bf16.msra.mxu1 %v1973_v15  ;;  %v2001_v52 = vld [vmem:[%s2708_s1 + $0x128] sm:$0xff]   ;;  %v2006_v53 = vld [vmem:[%s2708_s1 + $0x180] sm:$0xff]   ;;  %v58_v57 = vld [vmem:[%s2707_s0 + $0x30] sm:$0xff] }
  0x12   :  { %1796 = vmatprep.subr.bf16.mxu1 %v1976_v18  ;;  %v57_v54 = vld [vmem:[%s2707_s0 + $0x28] sm:$0xff]  ;;  %v65_v58 = vpack.c.bf16 %v58_v57, %v58_v57  ;;  %v2003_v59 = vld [vmem:[%s2708_s1 + $0x130] sm:$0xff]   ;;  %v2004_v60 = vld [vmem:[%s2708_s1 + $0x178] sm:$0xff]  }
  0x13   :  { %1775 = vmatpush3.bf16.msra.mxu0 %v1975_v17  ;;  %v64_v56 = vpack.c.bf16 %v57_v54, %v57_v54  ;;  %v2005_v61 = vld [vmem:[%s2708_s1 + $0x138] sm:$0xff]   ;;  %v56_v62 = vld [vmem:[%s2707_s0 + $0x20] sm:$0xff] }
  0x14   :  { %1776 = vmatprep.subr.bf16.mxu0 %v1978_v20  ;;  %v63_v63 = vpack.c.bf16 %v56_v62, %v56_v62 }
  0x15   :  { %1797 = vmatpush3.bf16.msra.mxu1 %v1977_v19 }
  0x16   :  { %1798 = vmatprep.subr.bf16.mxu1 %v1980_v22 }
  0x17   :  { %1777 = vmatpush3.bf16.msra.mxu0 %v1979_v21 }
  0x18   :  { %1778 = vmatprep.subr.bf16.mxu0 %v1982_v24 }
  0x19   :  { %1799 = vmatpush3.bf16.msra.mxu1 %v1981_v23 }
  0x1a   :  { %1800 = vmatprep.subr.bf16.mxu1 %v1984_v26 }
  0x1b   :  { %1779 = vmatpush3.bf16.msra.mxu0 %v1983_v25 }
  0x1c   :  { %1780 = vmatprep.subr.bf16.mxu0 %v1986_v28 }
  0x1d   :  { %1801 = vmatpush3.bf16.msra.mxu1 %v1985_v27 }
  0x1e   :  { %1802 = vmatprep.subr.bf16.mxu1 %v1988_v30 }
  0x1f   :  { %1781 = vmatpush3.bf16.msra.mxu0 %v1987_v29 }
  0x20   :  { %1810 = vmatprep.subr.bf16.mxu0 %v1990_v36 }
  0x21   :  { %1803 = vmatpush3.bf16.msra.mxu1 %v1989_v33 }
  0x22   :  { %502 = vmatmul.mubr.bf16.vlgmr.msra.gmra.mrb[0].mxu0 %v59_v35  ;;  %1868 = vmatprep.subr.bf16.mxu1 %v2145_v44 }
  0x23   :  { %1811 = vmatpush3.bf16.msra.mxu0 %v1991_v39  ;;  %581 = vmatprep.mubr.bf16.mxu0 %v64_v56 }
  0x24   :  { %542 = vmatmul.mubr.bf16.vlgmr.msra.gmra.mrb[0].mxu1 %v61_v41  ;;  %1812 = vmatprep.subr.bf16.mxu0 %v1992_v42 }
  0x25   :  { %1870 = vmatprep.mubr.msk.bf16.mxu1 %vm2146_vm0, %v2145_v44  ;;  %1869 = vmatpush3.bf16.msra.mxu1 %v2006_v53 }
  0x26   :  { %1874 = vmatprep.subr.bf16.mxu1 %v2145_v44 }
  0x27   :  { %1813 = vmatpush3.bf16.msra.mxu0 %v1993_v43 }
  0x28   :  { %1814 = vmatprep.subr.bf16.mxu0 %v1994_v45 }
  0x2b   :  { %1815 = vmatpush3.bf16.msra.mxu0 %v1995_v46 }
  0x2c   :  { %1816 = vmatprep.subr.bf16.mxu0 %v1996_v47  ;;  %1871 = vmatmul.mubr.msk.bf16.vlgmr.msra.gmra.mrb[4].mxu1 %vm465_vm1, %v65_v58 }
  0x2d   :  { %1890 = vmatprep.mubr.msk.bf16.mxu1 %vm2146_vm0, %v2145_v44 }
  0x2f   :  { %1817 = vmatpush3.bf16.msra.mxu0 %v1997_v48 }
  0x30   :  { %1818 = vmatprep.subr.bf16.mxu0 %v1998_v49 }
  0x33   :  { %1819 = vmatpush3.bf16.msra.mxu0 %v1999_v50 }
  0x34   :  { %1820 = vmatprep.subr.bf16.mxu0 %v2000_v51 }
  0x37   :  { %1821 = vmatpush3.bf16.msra.mxu0 %v2001_v52 }
  0x38   :  { %1822 = vmatprep.subr.bf16.mxu0 %v2002_v55 }
  0x3b   :  { %1823 = vmatpush3.bf16.msra.mxu0 %v2003_v59 }
  0x3c   :  { %1824 = vmatprep.subr.bf16.mxu0 %v2004_v60 }
  0x3f   :  { %1825 = vmatpush3.bf16.msra.mxu0 %v2005_v61 }
  0x40   :  { %1894 = vmatprep.subr.bf16.mxu0 %v2145_v44 }
  0x42   :  { %582 = vmatmul.mubr.bf16.vlgmr.msra.gmra.mrb[4].mxu0 %v63_v63 }
  0x43   :  { %1902 = vmatprep.mubr.msk.bf16.mxu0 %vm2146_vm0, %v2145_v44 }
  0x44   :  { %20 = vsyncpa [#allocation3], 0  ;;  %v2007_v0 = vld [vmem:[%s2710_s3] sm:$0xff]   ;;  %v2008_v1 = vld [vmem:[%s2710_s3 + $0x8] sm:$0xff]   ;;  %vm783_vm2 = vcmask 523264   ;;  %vm852_vm3 = vcmask 261120  }
  0x45   :  { %1875 = vmatpush3.bf16.msra.mxu1 %v2007_v0  ;;  %v2009_v2 = vld [vmem:[%s2710_s3 + $0x10] sm:$0xff]   ;;  %v2010_v3 = vld [vmem:[%s2710_s3 + $0x18] sm:$0xff]   ;;  %v2011_v4 = vld [vmem:[%s2710_s3 + $0x20] sm:$0xff]  }
  0x46   :  { %1876 = vmatprep.subr.bf16.mxu1 %v2145_v44  ;;  %v2012_v5 = vld [vmem:[%s2710_s3 + $0x28] sm:$0xff]   ;;  %v2013_v6 = vld [vmem:[%s2710_s3 + $0x30] sm:$0xff]   ;;  %v2014_v7 = vld [vmem:[%s2710_s3 + $0x38] sm:$0xff]  }
  0x47   :  { %v2015_v8 = vld [vmem:[%s2712_s5] sm:$0xff]   ;;  %v2016_v9 = vld [vmem:[%s2712_s5 + $0x8] sm:$0xff]   ;;  %v2017_v36 = vld [vmem:[%s2712_s5 + $0x10] sm:$0xff]  }
  0x48   :  { %1895 = vmatpush3.bf16.msra.mxu0 %v2015_v8  ;;  %v1630_v11 = vld [vmem:[%s2709_s2] ss:$0 sm:$0xff]  ;;  %v2018_v37 = vld [vmem:[%s2712_s5 + $0x18] sm:$0xff]   ;;  %v2020_v48 = vld [vmem:[%s2714_s7 + $0x8] sm:$0xff]  }
  0x49   :  { %1877 = vmatpush3.bf16.msra.mxu1 %v2008_v1  ;;  %1896 = vmatprep.subr.bf16.mxu0 %v2145_v44  ;;  %v2019_v38 = vld [vmem:[%s2714_s7] sm:$0xff]   ;;  %v2022_v58 = vld [vmem:[%s2716_s9 + $0x8] sm:$0xff]  }
  0x4a   :  { %1878 = vmatprep.subr.bf16.mxu1 %v2145_v44  ;;  %v1681_v39 = vld [vmem:[%s2711_s4] ss:$0 sm:$0xff]  ;;  %v2024_v60 = vld [vmem:[%s2718_s11 + $0x8] sm:$0xff]  }
  0x4b   :  { %v2021_v49 = vld [vmem:[%s2716_s9] sm:$0xff]  }
  0x4c   :  { %1897 = vmatpush3.bf16.msra.mxu0 %v2016_v9  ;;  %v1690_v50 = vld [vmem:[%s2713_s6] ss:$0 sm:$0xff]  ;;  %v2032_v9 = vld [vmem:[%s2720_s13 + $0xc] ss:$28 sps:$4 sm:$0xff]  }
  0x4d   :  { %1879 = vmatpush3.bf16.msra.mxu1 %v2009_v2  ;;  %1898 = vmatprep.subr.bf16.mxu0 %v2145_v44  ;;  %v2023_v59 = vld [vmem:[%s2718_s11] sm:$0xff]  }
  0x4e   :  { %1880 = vmatprep.subr.bf16.mxu1 %v2145_v44  ;;  %v1696_v61 = vld [vmem:[%s2715_s8] ss:$0 sm:$0xff] }
  0x4f   :  { %v2029_v8 = vld [vmem:[%s2720_s13 + $0x4] ss:$28 sps:$4 sm:$0xff]  }
  0x50   :  { %1899 = vmatpush3.bf16.msra.mxu0 %v2017_v36  ;;  %v2048_v36 = vld [vmem:[%s2720_s13 + $0xb0] ss:$28 sps:$4 sm:$0xff]  }
  0x51   :  { %1881 = vmatpush3.bf16.msra.mxu1 %v2010_v3  ;;  %1900 = vmatprep.subr.bf16.mxu0 %v2145_v44 }
  0x52   :  { %1882 = vmatprep.subr.bf16.mxu1 %v2145_v44 }
  0x54   :  { %1901 = vmatpush3.bf16.msra.mxu0 %v2018_v37  ;;  %v2056_v37 = vld [vmem:[%s2720_s13 + $0xec] ss:$28 sps:$4 sm:$0xff]  }
  0x55   :  { %1883 = vmatpush3.bf16.msra.mxu1 %v2011_v4  ;;  %1914 = vmatprep.subr.bf16.mxu0 %v2145_v44 }
  0x56   :  { %1884 = vmatprep.subr.bf16.mxu1 %v2145_v44 }
  0x59   :  { %1885 = vmatpush3.bf16.msra.mxu1 %v2012_v5  ;;  %v2025_v5 = vld [vmem:[%s2718_s11 + $0x10] sm:$0xff]  }
  0x5a   :  { %1886 = vmatprep.subr.bf16.mxu1 %v2145_v44 }
  0x5d   :  { %1887 = vmatpush3.bf16.msra.mxu1 %v2013_v6  ;;  %v2026_v6 = vld [vmem:[%s2718_s11 + $0x18] sm:$0xff]  }
  0x5e   :  { %1888 = vmatprep.subr.bf16.mxu1 %v2145_v44 }
  0x61   :  { %1889 = vmatpush3.bf16.msra.mxu1 %v2014_v7  ;;  %v2027_v7 = vld [vmem:[%s2720_s13] ss:$28 sps:$4 sm:$0xff]  }
  0x62   :  { %1906 = vmatprep.subr.bf16.mxu1 %v2145_v44 }
  0xf5   :  { %v1782_v10 = vpop.f32.mrb[0].mxu0 }
  0xf6   :  { %v1783_v12 = vpop.f32.mrb[1].mxu0 }
  0xf7   :  { %v1784_v13 = vadd.f32 %v1783_v12, %v1782_v10  ;;  %v1785_v14 = vpop.f32.mrb[2].mxu0  ;;  %v1804_v15 = vpop.f32.mrb[0].mxu1  ;;  %v2035_v10 = vld [vmem:[%s2720_s13 + $0x3c] ss:$28 sps:$4 sm:$0xff]   ;;  %v2041_v12 = vld [vmem:[%s2720_s13 + $0x74] ss:$28 sps:$4 sm:$0xff]  }
  0xf8   :  { %v1786_v16 = vpop.f32.mrb[3].mxu0  ;;  %v1805_v18 = vpop.f32.mrb[1].mxu1  ;;  %v2047_v14 = vld [vmem:[%s2720_s13 + $0xac] ss:$28 sps:$4 sm:$0xff]  }
  0xf9   :  { %v504_v17 = vadd.f32 %v1784_v13, %v1630_v11  ;;  %v1806_v19 = vadd.f32 %v1805_v18, %v1804_v15  ;;  %v1807_v20 = vpop.f32.mrb[2].mxu1  ;;  %v2033_v11 = vld [vmem:[%s2720_s13 + $0x38] ss:$28 sps:$4 sm:$0xff]   ;;  %v2039_v13 = vld [vmem:[%s2720_s13 + $0x70] ss:$28 sps:$4 sm:$0xff]  }
  0xfa   :  { %v1808_v21 = vpop.f32.mrb[3].mxu1  ;;  %v2045_v15 = vld [vmem:[%s2720_s13 + $0xa8] ss:$28 sps:$4 sm:$0xff]   ;;  %v2059_v18 = vld [vmem:[%s2720_s13 + $0x11c] ss:$28 sps:$4 sm:$0xff]  }
  0xfb   :  { %v544_v22 = vadd.f32 %v1806_v19, %v504_v17  ;;  %v2053_v16 = vld [vmem:[%s2720_s13 + $0xe4] ss:$28 sps:$4 sm:$0xff]   ;;  %v2057_v19 = vld [vmem:[%s2720_s13 + $0x118] ss:$28 sps:$4 sm:$0xff]   ;;  %v2063_v21 = vld [vmem:[%s2720_s13 + $0x150] ss:$28 sps:$4 sm:$0xff]  }
  0xfc   :  { %v2051_v17 = vld [vmem:[%s2720_s13 + $0xe0] ss:$28 sps:$4 sm:$0xff]   ;;  %v2065_v20 = vld [vmem:[%s2720_s13 + $0x154] ss:$28 sps:$4 sm:$0xff]  }
  0xff   :  { %v623_v23 = vpop.f32.mrb[4].mxu1 }
 0x100   :  { %v1872_v24 = vpop.f32.mrb[5].mxu1 }
 0x101   :  { %v626_v25 = vpop.f32.mrb[6].mxu1 }
 0x102   :  { %v1873_v26 = vpop.f32.mrb[7].mxu1 }
 0x115   :  { %v1826_v27 = vpop.f32.mrb[4].mxu0 }
 0x116   :  { %v1827_v28 = vpop.f32.mrb[5].mxu0 }
 0x117   :  { %v1828_v29 = vadd.f32 %v1827_v28, %v1826_v27  ;;  %v1829_v30 = vpop.f32.mrb[6].mxu0 }
 0x118   :  { %v1830_v31 = vpop.f32.mrb[7].mxu0 }
 0x119   :  { %v584_v32 = vadd.f32 %v1828_v29, %v544_v22  ;;  %v1700_v22 = vld [vmem:[%s2717_s10] ss:$0 sm:$0xff]  ;;  %v2030_v29 = vld [vmem:[%s2720_s13 + $0x8] ss:$28 sps:$4 sm:$0xff]  }
 0x11a   :  { %v2038_v31 = vld [vmem:[%s2720_s13 + $0x44] ss:$28 sps:$4 sm:$0xff]  }
 0x11b   :  { %v624_v33 = vadd.f32 %v623_v23, %v584_v32  ;;  %v2036_v32 = vld [vmem:[%s2720_s13 + $0x40] ss:$28 sps:$4 sm:$0xff]  }
 0x11d   :  { %v629_v34 = vmax.f32 %v624_v33, 0.0  ;;  %v2044_v33 = vld [vmem:[%s2720_s13 + $0x7c] ss:$28 sps:$4 sm:$0xff]  }
 0x11f   :  { %v630_v35 = vpack.c.bf16 %v629_v34, %v629_v34  ;;  %v2042_v34 = vld [vmem:[%s2720_s13 + $0x78] ss:$28 sps:$4 sm:$0xff]  }
 0x121   :  { %1891 = vmatmul.mubr.bf16.vlgmr.msra.gmra.mrb[8].mxu1 %v630_v35  ;;  %v2050_v35 = vld [vmem:[%s2720_s13 + $0xb4] ss:$28 sps:$4 sm:$0xff]  }
 0x122   :  { %1910 = vmatprep.mubr.msk.bf16.mxu1 %vm2146_vm0, %v2145_v44  ;;  %1907 = vmatpush3.bf16.msra.mxu1 %v2019_v38  ;;  %v2054_v38 = vld [vmem:[%s2720_s13 + $0xe8] ss:$28 sps:$4 sm:$0xff]  }
 0x123   :  { %1908 = vmatprep.subr.bf16.mxu1 %v2145_v44 }
 0x126   :  { %1909 = vmatpush3.bf16.msra.mxu1 %v2020_v48  ;;  %v2077_v48 = vld [vmem:[%s2720_s13 + $0x14] ss:$28 sps:$4 sm:$0xff]  }
 0x127   :  { %1922 = vmatprep.subr.bf16.mxu1 %v2145_v44 }
 0x1f4   :  { %v736_v40 = vpop.f32.mrb[8].mxu1 }
 0x1f5   :  { %v737_v41 = vadd.f32 %v1681_v39, %v736_v40  ;;  %v1892_v42 = vpop.f32.mrb[9].mxu1  ;;  %v2062_v39 = vld [vmem:[%s2720_s13 + $0x124] ss:$28 sps:$4 sm:$0xff]  }
 0x1f6   :  { %v739_v43 = vpop.f32.mrb[10].mxu1  ;;  %v2060_v40 = vld [vmem:[%s2720_s13 + $0x120] ss:$28 sps:$4 sm:$0xff]   ;;  %v2066_v42 = vld [vmem:[%s2720_s13 + $0x158] ss:$28 sps:$4 sm:$0xff]  }
 0x1f7   :  { %v742_v45 = vmax.f32 %v737_v41, 0.0  ;;  %v1893_v46 = vpop.f32.mrb[11].mxu1  ;;  %v2068_v41 = vld [vmem:[%s2720_s13 + $0x15c] ss:$28 sps:$4 sm:$0xff]   ;;  %v2071_v43 = vld [vmem:[%s2720_s13 + $0x18c] ss:$28 sps:$4 sm:$0xff]  }
 0x1f8   :  { %v2069_v46 = vld [vmem:[%s2720_s13 + $0x188] ss:$28 sps:$4 sm:$0xff]  }
 0x1f9   :  { %v743_v47 = vpack.c.bf16 %v742_v45, %v742_v45  ;;  %v2074_v45 = vld [vmem:[%s2720_s13 + $0x194] ss:$28 sps:$4 sm:$0xff]  }
 0x1fb   :  { %1903 = vmatmul.mubr.msk.bf16.vlgmr.msra.gmra.mrb[8].mxu0 %vm783_vm2, %v743_v47  ;;  %v2072_v47 = vld [vmem:[%s2720_s13 + $0x190] ss:$28 sps:$4 sm:$0xff]  }
 0x1fc   :  { %1918 = vmatprep.mubr.msk.bf16.mxu0 %vm2146_vm0, %v2145_v44  ;;  %1915 = vmatpush3.bf16.msra.mxu0 %v2021_v49  ;;  %v2147_v49 = vmov 0  }
 0x1fd   :  { %1916 = vmatprep.subr.bf16.mxu0 %v2145_v44 }
 0x200   :  { %1917 = vmatpush3.bf16.msra.mxu0 %v2022_v58  ;;  %v2078_v58 = vld [vmem:[%s2720_s13 + $0x18] ss:$28 sps:$4 sm:$0xff]  }
 0x201   :  { %1439 = vmatprep.subr.bf16.mxu0 %v2029_v8  ;;  %v2097_v8 = vld [vmem:[%s2720_s13 + $0x12c] ss:$28 sps:$4 sm:$0xff]  }
 0x2ce   :  { %v821_v51 = vpop.f32.mrb[8].mxu0 }
 0x2cf   :  { %v822_v52 = vadd.f32 %v1690_v50, %v821_v51  ;;  %v1904_v53 = vpop.f32.mrb[9].mxu0  ;;  %v1704_v50 = vld [vmem:[%s2719_s12] ss:$0 sm:$0xff] }
 0x2d0   :  { %v824_v54 = vpop.f32.mrb[10].mxu0 }
 0x2d1   :  { %v827_v55 = vmax.f32 %v822_v52, 0.0  ;;  %v1905_v56 = vpop.f32.mrb[11].mxu0 }
 0x2d3   :  { %v828_v57 = vpack.c.bf16 %v827_v55, %v827_v55 }
 0x2d5   :  { %1911 = vmatmul.mubr.msk.bf16.vlgmr.msra.gmra.mrb[12].mxu1 %vm852_vm3, %v828_v57  ;;  %v2075_v57 = vld [vmem:[%s2720_s13 + $0x10] ss:$28 sps:$4 sm:$0xff]  }
 0x2d6   :  { %1930 = vmatprep.mubr.msk.bf16.mxu1 %vm2146_vm0, %v2145_v44  ;;  %1923 = vmatpush3.bf16.msra.mxu1 %v2023_v59 }
 0x2d7   :  { %1924 = vmatprep.subr.bf16.mxu1 %v2145_v44 }
 0x2da   :  { %1925 = vmatpush3.bf16.msra.mxu1 %v2024_v60  ;;  %v2081_v60 = vld [vmem:[%s2720_s13 + $0x4c] ss:$28 sps:$4 sm:$0xff]  }
 0x2db   :  { %1926 = vmatprep.subr.bf16.mxu1 %v2145_v44 }
 0x2de   :  { %1927 = vmatpush3.bf16.msra.mxu1 %v2025_v5  ;;  %v2093_v5 = vld [vmem:[%s2720_s13 + $0xf4] ss:$28 sps:$4 sm:$0xff]  }
 0x2df   :  { %1928 = vmatprep.subr.bf16.mxu1 %v2145_v44 }
 0x2e2   :  { %1929 = vmatpush3.bf16.msra.mxu1 %v2026_v6  ;;  %v2091_v6 = vld [vmem:[%s2720_s13 + $0xf0] ss:$28 sps:$4 sm:$0xff]  }
 0x2e3   :  { %1480 = vmatprep.subr.bf16.mxu1 %v2032_v9  ;;  %v2095_v9 = vld [vmem:[%s2720_s13 + $0x128] ss:$28 sps:$4 sm:$0xff]  }
 0x3a8   :  { %v890_v62 = vpop.f32.mrb[12].mxu1 }
 0x3a9   :  { %v891_v63 = vadd.f32 %v1696_v61, %v890_v62  ;;  %v1912_v0 = vpop.f32.mrb[13].mxu1  ;;  %v2079_v61 = vld [vmem:[%s2720_s13 + $0x48] ss:$28 sps:$4 sm:$0xff]   ;;  %v2082_v62 = vld [vmem:[%s2720_s13 + $0x50] ss:$28 sps:$4 sm:$0xff]  }
 0x3aa   :  { %v893_v1 = vpop.f32.mrb[14].mxu1  ;;  %v2083_v0 = vld [vmem:[%s2720_s13 + $0x80] ss:$28 sps:$4 sm:$0xff]  }
 0x3ab   :  { %v896_v2 = vmax.f32 %v891_v63, 0.0  ;;  %v1913_v3 = vpop.f32.mrb[15].mxu1  ;;  %v2085_v63 = vld [vmem:[%s2720_s13 + $0x84] ss:$28 sps:$4 sm:$0xff]  }
 0x3ac   :  { %v2086_v1 = vld [vmem:[%s2720_s13 + $0x88] ss:$28 sps:$4 sm:$0xff]   ;;  %v2087_v3 = vld [vmem:[%s2720_s13 + $0xb8] ss:$28 sps:$4 sm:$0xff]  }
 0x3ad   :  { %v897_v4 = vpack.c.bf16 %v896_v2, %v896_v2  ;;  %v2089_v2 = vld [vmem:[%s2720_s13 + $0xbc] ss:$28 sps:$4 sm:$0xff]  }
 0x3af   :  { %1919 = vmatmul.mubr.msk.bf16.vlgmr.msra.gmra.mrb[12].mxu0 %vm852_vm3, %v897_v4  ;;  %v2090_v4 = vld [vmem:[%s2720_s13 + $0xc0] ss:$28 sps:$4 sm:$0xff]  }
 0x3b0   :  { %1440 = vmatpush1.bf16.msra.mxu0 %v2027_v7  ;;  %1471 = vmatprep.mubr.bf16.mxu0 %v2147_v49  ;;  %v2094_v7 = vld [vmem:[%s2720_s13 + $0xf8] ss:$28 sps:$4 sm:$0xff]  }
 0x3b1   :  { %1441 = vmatprep.subr.bf16.mxu0 %v2035_v10  ;;  %v2098_v10 = vld [vmem:[%s2720_s13 + $0x130] ss:$28 sps:$4 sm:$0xff]  }
 0x3b4   :  { %1442 = vmatpush1.bf16.msra.mxu0 %v2033_v11  ;;  %v2101_v11 = vld [vmem:[%s2720_s13 + $0x164] ss:$28 sps:$4 sm:$0xff]  }
 0x3b5   :  { %1443 = vmatprep.subr.bf16.mxu0 %v2041_v12  ;;  %v2099_v12 = vld [vmem:[%s2720_s13 + $0x160] ss:$28 sps:$4 sm:$0xff]  }
 0x3b8   :  { %1444 = vmatpush1.bf16.msra.mxu0 %v2039_v13  ;;  %v2102_v13 = vld [vmem:[%s2720_s13 + $0x168] ss:$28 sps:$4 sm:$0xff]  }
 0x3b9   :  { %1445 = vmatprep.subr.bf16.mxu0 %v2047_v14  ;;  %v2105_v14 = vld [vmem:[%s2720_s13 + $0x19c] ss:$28 sps:$4 sm:$0xff]  }
 0x3bc   :  { %1446 = vmatpush1.bf16.msra.mxu0 %v2045_v15  ;;  %v2103_v15 = vld [vmem:[%s2720_s13 + $0x198] ss:$28 sps:$4 sm:$0xff]  }
 0x3bd   :  { %1447 = vmatprep.subr.bf16.mxu0 %v2053_v16  ;;  %v2106_v16 = vld [vmem:[%s2720_s13 + $0x1a0] ss:$28 sps:$4 sm:$0xff]   ;;  %s2148_s13 = smov [#allocation2]  }
 0x3c0   :  { %1448 = vmatpush1.bf16.msra.mxu0 %v2051_v17  ;;  %v1116_v17 = vlaneseq }
 0x3c1   :  { %1449 = vmatprep.subr.bf16.mxu0 %v2059_v18 }
 0x3c2   :  { %v1117_v18 = vshrl.u32 %v1116_v17, 7 }
 0x3c4   :  { %1450 = vmatpush1.bf16.msra.mxu0 %v2057_v19  ;;  %v1118_v19 = vsub.s32 0, %v1117_v18 }
 0x3c5   :  { %1451 = vmatprep.subr.bf16.mxu0 %v2065_v20  ;;  %v1126_v20 = vsub.s32 2, %v1117_v18 }
 0x3c8   :  { %1452 = vmatpush1.bf16.msra.mxu0 %v2063_v21  ;;  %v1114_v21 = vld [vmem:[%s2721_s14] sm:$0x7f]  ;;  %s1622_s14 = sshll.u32 %s2148_s13, 4  ;;  %s1623_s14 = int_to_ptr.vmem [resolvable:$true] %s1622_s14 }
 0x3c9   :  { %1453 = vmatprep.subr.bf16.mxu0 %v2071_v43  ;;  %v1134_v43 = vsub.s32 4, %v1117_v18  ;;  %s2121_s19 = scalar_lea.vmem %s1623_s14, 896  ;;  %p2126_p1 = scmp.lt.s32.totalorder %s1623_s14, %s1623_s14 }
 0x3ca   :  { %p2122_p0 = scmp.ne.s32.totalorder %s1623_s14, %s2121_s19  ;;  %p2127_p2 = scmp.lt.s32.totalorder %s2121_s19, %s2121_s19 }
 0x3cc   :  { %1454 = vmatpush1.bf16.msra.mxu0 %v2069_v46  ;;  %v1138_v46 = vsub.s32 5, %v1117_v18  ;;  %p2128_p3 = por %p2127_p2, %p2126_p1 }
 0x3cd   :  { %1521 = vmatprep.subr.bf16.mxu0 %v2077_v48 }
 0x3ce   :  { %p2129_p4 = pnand %p2128_p3, %p2122_p0 }
 0x482   :  { %v958_v23 = vpop.f32.mrb[12].mxu0 }
 0x483   :  { %v959_v24 = vadd.f32 %v1700_v22, %v958_v23  ;;  %v1920_v25 = vpop.f32.mrb[13].mxu0  ;;  %v1122_v22 = vsub.s32 1, %v1117_v18  ;;  %v1130_v23 = vsub.s32 3, %v1117_v18 }
 0x484   :  { %v961_v26 = vpop.f32.mrb[14].mxu0  ;;  %v1127_v25 = vrot.slane %v1114_v21, %v1126_v20 }
 0x485   :  { %v964_v27 = vmax.f32 %v959_v24, 0.0  ;;  %v1921_v28 = vpop.f32.mrb[15].mxu0  ;;  %v1119_v24 = vrot.slane %v1114_v21, %v1118_v19  ;;  %v1123_v26 = vrot.slane %v1114_v21, %v1122_v22 }
 0x487   :  { %v965_v30 = vpack.c.bf16 %v964_v27, %v964_v27  ;;  %v1131_v27 = vrot.slane %v1114_v21, %v1130_v23 }
 0x489   :  { %1931 = vmatmul.mubr.msk.bf16.vlgmr.msra.gmra.mrb[16].mxu1 %vm783_vm2, %v965_v30 }
 0x48a   :  { %1481 = vmatpush1.bf16.msra.mxu1 %v2030_v29  ;;  %1512 = vmatprep.mubr.bf16.mxu1 %v2147_v49 }
 0x48b   :  { %1482 = vmatprep.subr.bf16.mxu1 %v2038_v31 }
 0x48e   :  { %1483 = vmatpush1.bf16.msra.mxu1 %v2036_v32 }
 0x48f   :  { %1484 = vmatprep.subr.bf16.mxu1 %v2044_v33 }
 0x492   :  { %1485 = vmatpush1.bf16.msra.mxu1 %v2042_v34 }
 0x493   :  { %1486 = vmatprep.subr.bf16.mxu1 %v2050_v35 }
 0x496   :  { %1487 = vmatpush1.bf16.msra.mxu1 %v2048_v36 }
 0x497   :  { %1488 = vmatprep.subr.bf16.mxu1 %v2056_v37 }
 0x49a   :  { %1489 = vmatpush1.bf16.msra.mxu1 %v2054_v38 }
 0x49b   :  { %1490 = vmatprep.subr.bf16.mxu1 %v2062_v39 }
 0x49e   :  { %1491 = vmatpush1.bf16.msra.mxu1 %v2060_v40 }
 0x49f   :  { %1492 = vmatprep.subr.bf16.mxu1 %v2068_v41 }
 0x4a2   :  { %1493 = vmatpush1.bf16.msra.mxu1 %v2066_v42 }
 0x4a3   :  { %1494 = vmatprep.subr.bf16.mxu1 %v2074_v45  ;;  %v1142_v45 = vsub.s32 6, %v1117_v18 }
 0x4a5   :  { %v1143_v48 = vrot.slane %v1114_v21, %v1142_v45 }
 0x4a6   :  { %1495 = vmatpush1.bf16.msra.mxu1 %v2072_v47  ;;  %v1135_v47 = vrot.slane %v1114_v21, %v1134_v43 }
 0x4a7   :  { %1934 = vmatprep.subr.bf16.mxu1 %v2145_v44 }
 0x55c   :  { %v1042_v51 = vpop.f32.mrb[16].mxu1 }
 0x55d   :  { %v1043_v52 = vadd.f32 %v1704_v50, %v1042_v51  ;;  %v1932_v53 = vpop.f32.mrb[17].mxu1 }
 0x55e   :  { %v1045_v54 = vpop.f32.mrb[18].mxu1 }
 0x55f   :  { %v1048_v55 = vmax.f32 %v1043_v52, 0.0  ;;  %v1933_v56 = vpop.f32.mrb[19].mxu1 }
 0x561   :  { %v1049_v59 = vpack.c.bf16 %v1048_v55, %v1048_v55 }
 0x563   :  { %1472 = vmatmul.mubr.bf16.vlgmr.msra.gmra.mrb[16].mxu0 %v1049_v59  ;;  %1513 = vmatmul.mubr.bf16.vlgmr.msra.gmra.mrb[20].mxu1 %v1049_v59 }
 0x564   :  { %1522 = vmatpush1.bf16.msra.mxu0 %v2075_v57  ;;  %1935 = vmatpush3.bf16.msra.mxu1 %v2078_v58 }
 0x565   :  { %1523 = vmatprep.subr.bf16.mxu0 %v2081_v60  ;;  %1936 = vmatprep.subr.bf16.mxu1 %v2145_v44 }
 0x566   :  { %1553 = vmatprep.mubr.bf16.mxu0 %v2147_v49  ;;  %1950 = vmatprep.mubr.msk.bf16.mxu1 %vm2146_vm0, %v2145_v44  ;;  %v1139_v49 = vrot.slane %v1114_v21, %v1138_v46 }
 0x568   :  { %1524 = vmatpush1.bf16.msra.mxu0 %v2079_v61  ;;  %1937 = vmatpush3.bf16.msra.mxu1 %v2082_v62 }
 0x569   :  { %1525 = vmatprep.subr.bf16.mxu0 %v2085_v63  ;;  %1938 = vmatprep.subr.bf16.mxu1 %v2145_v44 }
 0x56c   :  { %1526 = vmatpush1.bf16.msra.mxu0 %v2083_v0  ;;  %1939 = vmatpush3.bf16.msra.mxu1 %v2086_v1 }
 0x56d   :  { %1527 = vmatprep.subr.bf16.mxu0 %v2089_v2  ;;  %1940 = vmatprep.subr.bf16.mxu1 %v2145_v44 }
 0x570   :  { %1528 = vmatpush1.bf16.msra.mxu0 %v2087_v3  ;;  %1941 = vmatpush3.bf16.msra.mxu1 %v2090_v4 }
 0x571   :  { %1529 = vmatprep.subr.bf16.mxu0 %v2093_v5  ;;  %1942 = vmatprep.subr.bf16.mxu1 %v2145_v44 }
 0x574   :  { %1530 = vmatpush1.bf16.msra.mxu0 %v2091_v6  ;;  %1943 = vmatpush3.bf16.msra.mxu1 %v2094_v7 }
 0x575   :  { %1531 = vmatprep.subr.bf16.mxu0 %v2097_v8  ;;  %1944 = vmatprep.subr.bf16.mxu1 %v2145_v44 }
 0x578   :  { %1532 = vmatpush1.bf16.msra.mxu0 %v2095_v9  ;;  %1945 = vmatpush3.bf16.msra.mxu1 %v2098_v10 }
 0x579   :  { %1533 = vmatprep.subr.bf16.mxu0 %v2101_v11  ;;  %1946 = vmatprep.subr.bf16.mxu1 %v2145_v44 }
 0x57c   :  { %1534 = vmatpush1.bf16.msra.mxu0 %v2099_v12  ;;  %1947 = vmatpush3.bf16.msra.mxu1 %v2102_v13 }
 0x57d   :  { %1535 = vmatprep.subr.bf16.mxu0 %v2105_v14  ;;  %1948 = vmatprep.subr.bf16.mxu1 %v2145_v44 }
 0x580   :  { %1536 = vmatpush1.bf16.msra.mxu0 %v2103_v15  ;;  %1949 = vmatpush3.bf16.msra.mxu1 %v2106_v16 }
 0x583   :  { %1554 = vmatmul.mubr.bf16.vlgmr.msra.gmra.mrb[20].mxu0 %v1049_v59  ;;  %1951 = vmatmul.mubr.bf16.vlgmr.msra.gmra.mrb[24].mxu1 %v1049_v59 }
 0x636   :  { %v1473_v28 = vpop.f32.mrb[16].mxu0  ;;  %v1514_v44 = vpop.f32.mrb[20].mxu1 }
 0x637   :  { %v1474_v29 = vadd.f32 %v1473_v28, %v1119_v24  ;;  %v1515_v30 = vadd.f32 %v1514_v44, %v1127_v25  ;;  %v1475_v31 = vpop.f32.mrb[17].mxu0  ;;  %v1516_v32 = vpop.f32.mrb[21].mxu1 }
 0x638   :  { %v1476_v33 = vadd.f32 %v1475_v31, %v1123_v26  ;;  %v1517_v34 = vadd.f32 %v1516_v32, %v1131_v27  ;;  %v1477_v35 = vpop.f32.mrb[18].mxu0  ;;  %v1518_v36 = vpop.f32.mrb[22].mxu1 }
 0x639   :  { %2107 = vtanh.f32 %v1474_v29  ;;  %v1478_v37 = vpop.f32.mrb[19].mxu0  ;;  %v1519_v38 = vpop.f32.mrb[23].mxu1 }
 0x63a   :  { %2109 = vtanh.f32 %v1515_v30 }
 0x63b   :  { %2111 = vtanh.f32 %v1476_v33 }
 0x63c   :  { %2113 = vtanh.f32 %v1517_v34 }
 0x643   :  { %v2108_v39 = vpop.eup %2107 }
 0x644   :  { %v2110_v40 = vpop.eup %2109  ;;  %1609 = vst [vmem:[#allocation2] sm:$0xff] %v2108_v39 }
 0x645   :  { %v2112_v41 = vpop.eup %2111  ;;  %1611 = vst [vmem:[#allocation2 + $0x10] sm:$0xff] %v2110_v40 }
 0x646   :  { %v2114_v42 = vpop.eup %2113  ;;  %1610 = vst [vmem:[#allocation2 + $0x8] sm:$0xff] %v2112_v41 }
 0x647   :  { %1612 = vst [vmem:[#allocation2 + $0x18] sm:$0xff] %v2114_v42 }
 0x656   :  { %v1555_v50 = vpop.f32.mrb[20].mxu0  ;;  %v1596_v51 = vpop.f32.mrb[24].mxu1 }
 0x657   :  { %v1556_v52 = vadd.f32 %v1555_v50, %v1135_v47  ;;  %v1597_v53 = vadd.f32 %v1596_v51, %v1143_v48  ;;  %v1557_v54 = vpop.f32.mrb[21].mxu0  ;;  %v1952_v55 = vpop.f32.mrb[25].mxu1 }
 0x658   :  { %v1558_v56 = vadd.f32 %v1557_v54, %v1139_v49  ;;  %v1559_v57 = vpop.f32.mrb[22].mxu0  ;;  %v1599_v58 = vpop.f32.mrb[26].mxu1 }
 0x659   :  { %2115 = vtanh.f32 %v1556_v52  ;;  %v1560_v59 = vpop.f32.mrb[23].mxu0  ;;  %v1953_v60 = vpop.f32.mrb[27].mxu1 }
 0x65a   :  { %2117 = vtanh.f32 %v1597_v53 }
 0x65b   :  { %2119 = vtanh.f32 %v1558_v56 }
 0x663   :  { %v2116_v61 = vpop.eup %2115 }
 0x664   :  { %v2118_v62 = vpop.eup %2117  ;;  %1613 = vst [vmem:[#allocation2 + $0x20] sm:$0xff] %v2116_v61 }
 0x665   :  { %v2120_v63 = vpop.eup %2119  ;;  %1615 = vst.msk [vmem:[#allocation2 + $0x30] sm:$0xff] %vm465_vm1, %v2118_v62 }
 0x666   :  { %1614 = vst [vmem:[#allocation2 + $0x28] sm:$0xff] %v2120_v63 }
 0x667   :  { %2132 = shalt.err (!%p2129_p4)
}
 0x668   :  { %s2133_s20 = scalar_lea.hbm %s2722_s15, 896 }
 0x669   :  { %p2134_p5 = scmp.ne.s32.totalorder %s2722_s15, %s2133_s20  ;;  %p2137_p6 = scmp.lt.u32.totalorder %s2133_s20, %s2722_s15 }
 0x66b   :  { %p2139_p7 = pnand %p2137_p6, %p2134_p5 }
 0x66d   :  { %2142 = shalt.err (!%p2139_p7)
}
 0x66e   :  { %1625 = dma.vmem_to_hbm [thread:$0]  %s1623_s14, 896, %s2722_s15, [#allocation3]  }
 0x66f   :  { %2143 = dma.done.wait [#allocation3], 896  }
 0x670   :  { %2144 = vsyncadd [#allocation3], 4294966400 }
 0x671   :  { %1629 = vsyncpa [#allocation3], 1 }

// kernel: tpu_custom_call.1
= control target key start
LH: loop header
LB: loop body
LE: loop exit
PB: predicated region body
PF: predicated region fallthrough
CT: control target
= control target key end

     0   :  { %v2145_v44 = vmov 0.0   ;;  %vm2146_vm0 = vmmov 0   ;;  %vm465_vm1 = vcmask 130048   ;;  %s2707_s0 = inlined_call_operand.vmem [shape: f32[8,784], index: 0, kind: input, shape index: {}]   ;;  %s2708_s1 = inlined_call_operand.vmem [shape: bf16[784,128], index: 1, kind: input, shape index: {}]   ;;  %s2709_s2 = inlined_call_operand.vmem [shape: f32[1,128], index: 2, kind: input, shape index: {}]   ;;  %s2710_s3 = inlined_call_operand.vmem [shape: bf16[128,64], index: 3, kind: input, shape index: {}]   ;;  %s2711_s4 = inlined_call_operand.vmem [shape: f32[1,64], index: 4, kind: input, shape index: {}]   ;;  %s2712_s5 = inlined_call_operand.vmem [shape: bf16[64,32], index: 5, kind: input, shape index: {}]   ;;  %s2713_s6 = inlined_call_operand.vmem [shape: f32[1,32], index: 6, kind: input, shape index: {}]   ;;  %s2714_s7 = inlined_call_operand.vmem [shape: bf16[32,32], index: 7, kind: input, shape index: {}]   ;;  %s2715_s8 = inlined_call_operand.vmem [shape: f32[1,32], index: 8, kind: input, shape index: {}]   ;;  %s2716_s9 = inlined_call_operand.vmem [shape: bf16[32,64], index: 9, kind: input, shape index: {}]   ;;  %s2717_s10 = inlined_call_operand.vmem [shape: f32[1,64], index: 10, kind: input, shape index: {}]   ;;  %s2718_s11 = inlined_call_operand.vmem [shape: bf16[64,128], index: 11, kind: input, shape index: {}]   ;;  %s2719_s12 = inlined_call_operand.vmem [shape: f32[1,128], index: 12, kind: input, shape index: {}]   ;;  %s2720_s13 = inlined_call_operand.vmem [shape: bf16[128,784], index: 13, kind: input, shape index: {}]   ;;  %s2721_s14 = inlined_call_operand.vmem [shape: f32[1,784], index: 14, kind: input, shape index: {}]   ;;  %s2722_s15 = inlined_call_operand.hbm [shape: f32[8,784], index: 15, kind: output, shape index: {}]  }
   0x1   :  { %v1958_v0 = vld [vmem:[%s2708_s1 + $0x40] sm:$0xff]   ;;  %v1962_v4 = vld [vmem:[%s2708_s1 + $0x48] sm:$0xff]   ;;  %v1966_v8 = vld [vmem:[%s2708_s1 + $0x50] sm:$0xff]  }
   0x2   :  { %v1959_v1 = vld [vmem:[%s2708_s1] sm:$0xff]   ;;  %1766 = vmatprep.subr.bf16.mxu0 %v1958_v0  ;;  %v1963_v5 = vld [vmem:[%s2708_s1 + $0x8] sm:$0xff]   ;;  %v1967_v9 = vld [vmem:[%s2708_s1 + $0x10] sm:$0xff]  }
   0x3   :  { %v1960_v2 = vld [vmem:[%s2708_s1 + $0xc0] sm:$0xff]   ;;  %1767 = vmatpush3.bf16.msra.mxu0 %v1959_v1  ;;  %v1964_v6 = vld [vmem:[%s2708_s1 + $0xc8] sm:$0xff]   ;;  %v1968_v10 = vld [vmem:[%s2708_s1 + $0xd0] sm:$0xff]  }
   0x4   :  { %v1961_v3 = vld [vmem:[%s2708_s1 + $0x80] sm:$0xff]   ;;  %1788 = vmatprep.subr.bf16.mxu1 %v1960_v2  ;;  %1768 = vmatprep.subr.bf16.mxu0 %v1962_v4  ;;  %v1965_v7 = vld [vmem:[%s2708_s1 + $0x88] sm:$0xff]   ;;  %v1969_v11 = vld [vmem:[%s2708_s1 + $0x90] sm:$0xff]  }
   0x5   :  { %1789 = vmatpush3.bf16.msra.mxu1 %v1961_v3  ;;  %v1970_v12 = vld [vmem:[%s2708_s1 + $0x58] sm:$0xff]   ;;  %v1974_v16 = vld [vmem:[%s2708_s1 + $0x60] sm:$0xff]   ;;  %v1978_v20 = vld [vmem:[%s2708_s1 + $0x68] sm:$0xff]  }
   0x6   :  { %1790 = vmatprep.subr.bf16.mxu1 %v1964_v6  ;;  %v1971_v13 = vld [vmem:[%s2708_s1 + $0x18] sm:$0xff]   ;;  %v1975_v17 = vld [vmem:[%s2708_s1 + $0x20] sm:$0xff]   ;;  %v1979_v21 = vld [vmem:[%s2708_s1 + $0x28] sm:$0xff]  }
   0x7   :  { %1769 = vmatpush3.bf16.msra.mxu0 %v1963_v5  ;;  %v1972_v14 = vld [vmem:[%s2708_s1 + $0xd8] sm:$0xff]   ;;  %v1976_v18 = vld [vmem:[%s2708_s1 + $0xe0] sm:$0xff]   ;;  %v1980_v22 = vld [vmem:[%s2708_s1 + $0xe8] sm:$0xff]  }
   0x8   :  { %1770 = vmatprep.subr.bf16.mxu0 %v1966_v8  ;;  %v1973_v15 = vld [vmem:[%s2708_s1 + $0x98] sm:$0xff]   ;;  %v1977_v19 = vld [vmem:[%s2708_s1 + $0xa0] sm:$0xff]   ;;  %v1981_v23 = vld [vmem:[%s2708_s1 + $0xa8] sm:$0xff]  }
   0x9   :  { %1791 = vmatpush3.bf16.msra.mxu1 %v1965_v7  ;;  %v1982_v24 = vld [vmem:[%s2708_s1 + $0x70] sm:$0xff]   ;;  %v1986_v28 = vld [vmem:[%s2708_s1 + $0x78] sm:$0xff]   ;;  %v53_v31 = vld [vmem:[%s2707_s0 + $0x8] sm:$0xff] }
   0xa   :  { %1792 = vmatprep.subr.bf16.mxu1 %v1968_v10  ;;  %v1983_v25 = vld [vmem:[%s2708_s1 + $0x30] sm:$0xff]   ;;  %v1987_v29 = vld [vmem:[%s2708_s1 + $0x38] sm:$0xff]   ;;  %v60_v32 = vpack.c.bf16 %v53_v31, %v53_v31  ;;  %v52_v34 = vld [vmem:[%s2707_s0] sm:$0xff] }
   0xb   :  { %1771 = vmatpush3.bf16.msra.mxu0 %v1967_v9  ;;  %v1984_v26 = vld [vmem:[%s2708_s1 + $0xf0] sm:$0xff]   ;;  %v1988_v30 = vld [vmem:[%s2708_s1 + $0xf8] sm:$0xff]   ;;  %v59_v35 = vpack.c.bf16 %v52_v34, %v52_v34  ;;  %v1990_v36 = vld [vmem:[%s2708_s1 + $0x140] sm:$0xff]  }
   0xc   :  { %1772 = vmatprep.subr.bf16.mxu0 %v1970_v12  ;;  %v1985_v27 = vld [vmem:[%s2708_s1 + $0xb0] sm:$0xff]   ;;  %v1989_v33 = vld [vmem:[%s2708_s1 + $0xb8] sm:$0xff]   ;;  %501 = vmatprep.mubr.bf16.mxu0 %v60_v32  ;;  %v1991_v39 = vld [vmem:[%s2708_s1 + $0x100] sm:$0xff]  }
   0xd   :  { %1793 = vmatpush3.bf16.msra.mxu1 %v1969_v11  ;;  %v55_v37 = vld [vmem:[%s2707_s0 + $0x18] sm:$0xff]  ;;  %v54_v40 = vld [vmem:[%s2707_s0 + $0x10] sm:$0xff]  ;;  %v1992_v42 = vld [vmem:[%s2708_s1 + $0x148] sm:$0xff]  }
   0xe   :  { %1794 = vmatprep.subr.bf16.mxu1 %v1972_v14  ;;  %v62_v38 = vpack.c.bf16 %v55_v37, %v55_v37  ;;  %v61_v41 = vpack.c.bf16 %v54_v40, %v54_v40  ;;  %v1993_v43 = vld [vmem:[%s2708_s1 + $0x108] sm:$0xff]   ;;  %v1994_v45 = vld [vmem:[%s2708_s1 + $0x150] sm:$0xff]   ;;  %v1996_v47 = vld [vmem:[%s2708_s1 + $0x158] sm:$0xff]  }
   0xf   :  { %1773 = vmatpush3.bf16.msra.mxu0 %v1971_v13  ;;  %v1995_v46 = vld [vmem:[%s2708_s1 + $0x110] sm:$0xff]   ;;  %v1997_v48 = vld [vmem:[%s2708_s1 + $0x118] sm:$0xff]   ;;  %v1998_v49 = vld [vmem:[%s2708_s1 + $0x160] sm:$0xff]  }
  0x10   :  { %1774 = vmatprep.subr.bf16.mxu0 %v1974_v16  ;;  %541 = vmatprep.mubr.bf16.mxu1 %v62_v38  ;;  %v1999_v50 = vld [vmem:[%s2708_s1 + $0x120] sm:$0xff]   ;;  %v2000_v51 = vld [vmem:[%s2708_s1 + $0x168] sm:$0xff]   ;;  %v2002_v55 = vld [vmem:[%s2708_s1 + $0x170] sm:$0xff]  }
  0x11   :  { %1795 = vmatpush3.bf16.msra.mxu1 %v1973_v15  ;;  %v2001_v52 = vld [vmem:[%s2708_s1 + $0x128] sm:$0xff]   ;;  %v2006_v53 = vld [vmem:[%s2708_s1 + $0x180] sm:$0xff]   ;;  %v58_v57 = vld [vmem:[%s2707_s0 + $0x30] sm:$0xff] }
  0x12   :  { %1796 = vmatprep.subr.bf16.mxu1 %v1976_v18  ;;  %v57_v54 = vld [vmem:[%s2707_s0 + $0x28] sm:$0xff]  ;;  %v65_v58 = vpack.c.bf16 %v58_v57, %v58_v57  ;;  %v2003_v59 = vld [vmem:[%s2708_s1 + $0x130] sm:$0xff]   ;;  %v2004_v60 = vld [vmem:[%s2708_s1 + $0x178] sm:$0xff]  }
  0x13   :  { %1775 = vmatpush3.bf16.msra.mxu0 %v1975_v17  ;;  %v64_v56 = vpack.c.bf16 %v57_v54, %v57_v54  ;;  %v2005_v61 = vld [vmem:[%s2708_s1 + $0x138] sm:$0xff]   ;;  %v56_v62 = vld [vmem:[%s2707_s0 + $0x20] sm:$0xff] }
  0x14   :  { %1776 = vmatprep.subr.bf16.mxu0 %v1978_v20  ;;  %v63_v63 = vpack.c.bf16 %v56_v62, %v56_v62 }
  0x15   :  { %1797 = vmatpush3.bf16.msra.mxu1 %v1977_v19 }
  0x16   :  { %1798 = vmatprep.subr.bf16.mxu1 %v1980_v22 }
  0x17   :  { %1777 = vmatpush3.bf16.msra.mxu0 %v1979_v21 }
  0x18   :  { %1778 = vmatprep.subr.bf16.mxu0 %v1982_v24 }
  0x19   :  { %1799 = vmatpush3.bf16.msra.mxu1 %v1981_v23 }
  0x1a   :  { %1800 = vmatprep.subr.bf16.mxu1 %v1984_v26 }
  0x1b   :  { %1779 = vmatpush3.bf16.msra.mxu0 %v1983_v25 }
  0x1c   :  { %1780 = vmatprep.subr.bf16.mxu0 %v1986_v28 }
  0x1d   :  { %1801 = vmatpush3.bf16.msra.mxu1 %v1985_v27 }
  0x1e   :  { %1802 = vmatprep.subr.bf16.mxu1 %v1988_v30 }
  0x1f   :  { %1781 = vmatpush3.bf16.msra.mxu0 %v1987_v29 }
  0x20   :  { %1810 = vmatprep.subr.bf16.mxu0 %v1990_v36 }
  0x21   :  { %1803 = vmatpush3.bf16.msra.mxu1 %v1989_v33 }
  0x22   :  { %502 = vmatmul.mubr.bf16.vlgmr.msra.gmra.mrb[0].mxu0 %v59_v35  ;;  %1868 = vmatprep.subr.bf16.mxu1 %v2145_v44 }
  0x23   :  { %1811 = vmatpush3.bf16.msra.mxu0 %v1991_v39  ;;  %581 = vmatprep.mubr.bf16.mxu0 %v64_v56 }
  0x24   :  { %542 = vmatmul.mubr.bf16.vlgmr.msra.gmra.mrb[0].mxu1 %v61_v41  ;;  %1812 = vmatprep.subr.bf16.mxu0 %v1992_v42 }
  0x25   :  { %1870 = vmatprep.mubr.msk.bf16.mxu1 %vm2146_vm0, %v2145_v44  ;;  %1869 = vmatpush3.bf16.msra.mxu1 %v2006_v53 }
  0x26   :  { %1874 = vmatprep.subr.bf16.mxu1 %v2145_v44 }
  0x27   :  { %1813 = vmatpush3.bf16.msra.mxu0 %v1993_v43 }
  0x28   :  { %1814 = vmatprep.subr.bf16.mxu0 %v1994_v45 }
  0x2b   :  { %1815 = vmatpush3.bf16.msra.mxu0 %v1995_v46 }
  0x2c   :  { %1816 = vmatprep.subr.bf16.mxu0 %v1996_v47  ;;  %1871 = vmatmul.mubr.msk.bf16.vlgmr.msra.gmra.mrb[4].mxu1 %vm465_vm1, %v65_v58 }
  0x2d   :  { %1890 = vmatprep.mubr.msk.bf16.mxu1 %vm2146_vm0, %v2145_v44 }
  0x2f   :  { %1817 = vmatpush3.bf16.msra.mxu0 %v1997_v48 }
  0x30   :  { %1818 = vmatprep.subr.bf16.mxu0 %v1998_v49 }
  0x33   :  { %1819 = vmatpush3.bf16.msra.mxu0 %v1999_v50 }
  0x34   :  { %1820 = vmatprep.subr.bf16.mxu0 %v2000_v51 }
  0x37   :  { %1821 = vmatpush3.bf16.msra.mxu0 %v2001_v52 }
  0x38   :  { %1822 = vmatprep.subr.bf16.mxu0 %v2002_v55 }
  0x3b   :  { %1823 = vmatpush3.bf16.msra.mxu0 %v2003_v59 }
  0x3c   :  { %1824 = vmatprep.subr.bf16.mxu0 %v2004_v60 }
  0x3f   :  { %1825 = vmatpush3.bf16.msra.mxu0 %v2005_v61 }
  0x40   :  { %1894 = vmatprep.subr.bf16.mxu0 %v2145_v44 }
  0x42   :  { %582 = vmatmul.mubr.bf16.vlgmr.msra.gmra.mrb[4].mxu0 %v63_v63 }
  0x43   :  { %1902 = vmatprep.mubr.msk.bf16.mxu0 %vm2146_vm0, %v2145_v44 }
  0x44   :  { %20 = vsyncpa [#allocation3], 0  ;;  %v2007_v0 = vld [vmem:[%s2710_s3] sm:$0xff]   ;;  %v2008_v1 = vld [vmem:[%s2710_s3 + $0x8] sm:$0xff]   ;;  %vm783_vm2 = vcmask 523264   ;;  %vm852_vm3 = vcmask 261120  }
  0x45   :  { %1875 = vmatpush3.bf16.msra.mxu1 %v2007_v0  ;;  %v2009_v2 = vld [vmem:[%s2710_s3 + $0x10] sm:$0xff]   ;;  %v2010_v3 = vld [vmem:[%s2710_s3 + $0x18] sm:$0xff]   ;;  %v2011_v4 = vld [vmem:[%s2710_s3 + $0x20] sm:$0xff]  }
  0x46   :  { %1876 = vmatprep.subr.bf16.mxu1 %v2145_v44  ;;  %v2012_v5 = vld [vmem:[%s2710_s3 + $0x28] sm:$0xff]   ;;  %v2013_v6 = vld [vmem:[%s2710_s3 + $0x30] sm:$0xff]   ;;  %v2014_v7 = vld [vmem:[%s2710_s3 + $0x38] sm:$0xff]  }
  0x47   :  { %v2015_v8 = vld [vmem:[%s2712_s5] sm:$0xff]   ;;  %v2016_v9 = vld [vmem:[%s2712_s5 + $0x8] sm:$0xff]   ;;  %v2017_v36 = vld [vmem:[%s2712_s5 + $0x10] sm:$0xff]  }
  0x48   :  { %1895 = vmatpush3.bf16.msra.mxu0 %v2015_v8  ;;  %v1630_v11 = vld [vmem:[%s2709_s2] ss:$0 sm:$0xff]  ;;  %v2018_v37 = vld [vmem:[%s2712_s5 + $0x18] sm:$0xff]   ;;  %v2020_v48 = vld [vmem:[%s2714_s7 + $0x8] sm:$0xff]  }
  0x49   :  { %1877 = vmatpush3.bf16.msra.mxu1 %v2008_v1  ;;  %1896 = vmatprep.subr.bf16.mxu0 %v2145_v44  ;;  %v2019_v38 = vld [vmem:[%s2714_s7] sm:$0xff]   ;;  %v2022_v58 = vld [vmem:[%s2716_s9 + $0x8] sm:$0xff]  }
  0x4a   :  { %1878 = vmatprep.subr.bf16.mxu1 %v2145_v44  ;;  %v1681_v39 = vld [vmem:[%s2711_s4] ss:$0 sm:$0xff]  ;;  %v2024_v60 = vld [vmem:[%s2718_s11 + $0x8] sm:$0xff]  }
  0x4b   :  { %v2021_v49 = vld [vmem:[%s2716_s9] sm:$0xff]  }
  0x4c   :  { %1897 = vmatpush3.bf16.msra.mxu0 %v2016_v9  ;;  %v1690_v50 = vld [vmem:[%s2713_s6] ss:$0 sm:$0xff]  ;;  %v2032_v9 = vld [vmem:[%s2720_s13 + $0xc] ss:$28 sps:$4 sm:$0xff]  }
  0x4d   :  { %1879 = vmatpush3.bf16.msra.mxu1 %v2009_v2  ;;  %1898 = vmatprep.subr.bf16.mxu0 %v2145_v44  ;;  %v2023_v59 = vld [vmem:[%s2718_s11] sm:$0xff]  }
  0x4e   :  { %1880 = vmatprep.subr.bf16.mxu1 %v2145_v44  ;;  %v1696_v61 = vld [vmem:[%s2715_s8] ss:$0 sm:$0xff] }
  0x4f   :  { %v2029_v8 = vld [vmem:[%s2720_s13 + $0x4] ss:$28 sps:$4 sm:$0xff]  }
  0x50   :  { %1899 = vmatpush3.bf16.msra.mxu0 %v2017_v36  ;;  %v2048_v36 = vld [vmem:[%s2720_s13 + $0xb0] ss:$28 sps:$4 sm:$0xff]  }
  0x51   :  { %1881 = vmatpush3.bf16.msra.mxu1 %v2010_v3  ;;  %1900 = vmatprep.subr.bf16.mxu0 %v2145_v44 }
  0x52   :  { %1882 = vmatprep.subr.bf16.mxu1 %v2145_v44 }
  0x54   :  { %1901 = vmatpush3.bf16.msra.mxu0 %v2018_v37  ;;  %v2056_v37 = vld [vmem:[%s2720_s13 + $0xec] ss:$28 sps:$4 sm:$0xff]  }
  0x55   :  { %1883 = vmatpush3.bf16.msra.mxu1 %v2011_v4  ;;  %1914 = vmatprep.subr.bf16.mxu0 %v2145_v44 }
  0x56   :  { %1884 = vmatprep.subr.bf16.mxu1 %v2145_v44 }
  0x59   :  { %1885 = vmatpush3.bf16.msra.mxu1 %v2012_v5  ;;  %v2025_v5 = vld [vmem:[%s2718_s11 + $0x10] sm:$0xff]  }
  0x5a   :  { %1886 = vmatprep.subr.bf16.mxu1 %v2145_v44 }
  0x5d   :  { %1887 = vmatpush3.bf16.msra.mxu1 %v2013_v6  ;;  %v2026_v6 = vld [vmem:[%s2718_s11 + $0x18] sm:$0xff]  }
  0x5e   :  { %1888 = vmatprep.subr.bf16.mxu1 %v2145_v44 }
  0x61   :  { %1889 = vmatpush3.bf16.msra.mxu1 %v2014_v7  ;;  %v2027_v7 = vld [vmem:[%s2720_s13] ss:$28 sps:$4 sm:$0xff]  }
  0x62   :  { %1906 = vmatprep.subr.bf16.mxu1 %v2145_v44 }
  0xf5   :  { %v1782_v10 = vpop.f32.mrb[0].mxu0 }
  0xf6   :  { %v1783_v12 = vpop.f32.mrb[1].mxu0 }
  0xf7   :  { %v1784_v13 = vadd.f32 %v1783_v12, %v1782_v10  ;;  %v1785_v14 = vpop.f32.mrb[2].mxu0  ;;  %v1804_v15 = vpop.f32.mrb[0].mxu1  ;;  %v2035_v10 = vld [vmem:[%s2720_s13 + $0x3c] ss:$28 sps:$4 sm:$0xff]   ;;  %v2041_v12 = vld [vmem:[%s2720_s13 + $0x74] ss:$28 sps:$4 sm:$0xff]  }
  0xf8   :  { %v1786_v16 = vpop.f32.mrb[3].mxu0  ;;  %v1805_v18 = vpop.f32.mrb[1].mxu1  ;;  %v2047_v14 = vld [vmem:[%s2720_s13 + $0xac] ss:$28 sps:$4 sm:$0xff]  }
  0xf9   :  { %v504_v17 = vadd.f32 %v1784_v13, %v1630_v11  ;;  %v1806_v19 = vadd.f32 %v1805_v18, %v1804_v15  ;;  %v1807_v20 = vpop.f32.mrb[2].mxu1  ;;  %v2033_v11 = vld [vmem:[%s2720_s13 + $0x38] ss:$28 sps:$4 sm:$0xff]   ;;  %v2039_v13 = vld [vmem:[%s2720_s13 + $0x70] ss:$28 sps:$4 sm:$0xff]  }
  0xfa   :  { %v1808_v21 = vpop.f32.mrb[3].mxu1  ;;  %v2045_v15 = vld [vmem:[%s2720_s13 + $0xa8] ss:$28 sps:$4 sm:$0xff]   ;;  %v2059_v18 = vld [vmem:[%s2720_s13 + $0x11c] ss:$28 sps:$4 sm:$0xff]  }
  0xfb   :  { %v544_v22 = vadd.f32 %v1806_v19, %v504_v17  ;;  %v2053_v16 = vld [vmem:[%s2720_s13 + $0xe4] ss:$28 sps:$4 sm:$0xff]   ;;  %v2057_v19 = vld [vmem:[%s2720_s13 + $0x118] ss:$28 sps:$4 sm:$0xff]   ;;  %v2063_v21 = vld [vmem:[%s2720_s13 + $0x150] ss:$28 sps:$4 sm:$0xff]  }
  0xfc   :  { %v2051_v17 = vld [vmem:[%s2720_s13 + $0xe0] ss:$28 sps:$4 sm:$0xff]   ;;  %v2065_v20 = vld [vmem:[%s2720_s13 + $0x154] ss:$28 sps:$4 sm:$0xff]  }
  0xff   :  { %v623_v23 = vpop.f32.mrb[4].mxu1 }
 0x100   :  { %v1872_v24 = vpop.f32.mrb[5].mxu1 }
 0x101   :  { %v626_v25 = vpop.f32.mrb[6].mxu1 }
 0x102   :  { %v1873_v26 = vpop.f32.mrb[7].mxu1 }
 0x115   :  { %v1826_v27 = vpop.f32.mrb[4].mxu0 }
 0x116   :  { %v1827_v28 = vpop.f32.mrb[5].mxu0 }
 0x117   :  { %v1828_v29 = vadd.f32 %v1827_v28, %v1826_v27  ;;  %v1829_v30 = vpop.f32.mrb[6].mxu0 }
 0x118   :  { %v1830_v31 = vpop.f32.mrb[7].mxu0 }
 0x119   :  { %v584_v32 = vadd.f32 %v1828_v29, %v544_v22  ;;  %v1700_v22 = vld [vmem:[%s2717_s10] ss:$0 sm:$0xff]  ;;  %v2030_v29 = vld [vmem:[%s2720_s13 + $0x8] ss:$28 sps:$4 sm:$0xff]  }
 0x11a   :  { %v2038_v31 = vld [vmem:[%s2720_s13 + $0x44] ss:$28 sps:$4 sm:$0xff]  }
 0x11b   :  { %v624_v33 = vadd.f32 %v623_v23, %v584_v32  ;;  %v2036_v32 = vld [vmem:[%s2720_s13 + $0x40] ss:$28 sps:$4 sm:$0xff]  }
 0x11d   :  { %v629_v34 = vmax.f32 %v624_v33, 0.0  ;;  %v2044_v33 = vld [vmem:[%s2720_s13 + $0x7c] ss:$28 sps:$4 sm:$0xff]  }
 0x11f   :  { %v630_v35 = vpack.c.bf16 %v629_v34, %v629_v34  ;;  %v2042_v34 = vld [vmem:[%s2720_s13 + $0x78] ss:$28 sps:$4 sm:$0xff]  }
 0x121   :  { %1891 = vmatmul.mubr.bf16.vlgmr.msra.gmra.mrb[8].mxu1 %v630_v35  ;;  %v2050_v35 = vld [vmem:[%s2720_s13 + $0xb4] ss:$28 sps:$4 sm:$0xff]  }
 0x122   :  { %1910 = vmatprep.mubr.msk.bf16.mxu1 %vm2146_vm0, %v2145_v44  ;;  %1907 = vmatpush3.bf16.msra.mxu1 %v2019_v38  ;;  %v2054_v38 = vld [vmem:[%s2720_s13 + $0xe8] ss:$28 sps:$4 sm:$0xff]  }
 0x123   :  { %1908 = vmatprep.subr.bf16.mxu1 %v2145_v44 }
 0x126   :  { %1909 = vmatpush3.bf16.msra.mxu1 %v2020_v48  ;;  %v2077_v48 = vld [vmem:[%s2720_s13 + $0x14] ss:$28 sps:$4 sm:$0xff]  }
 0x127   :  { %1922 = vmatprep.subr.bf16.mxu1 %v2145_v44 }
 0x1f4   :  { %v736_v40 = vpop.f32.mrb[8].mxu1 }
 0x1f5   :  { %v737_v41 = vadd.f32 %v1681_v39, %v736_v40  ;;  %v1892_v42 = vpop.f32.mrb[9].mxu1  ;;  %v2062_v39 = vld [vmem:[%s2720_s13 + $0x124] ss:$28 sps:$4 sm:$0xff]  }
 0x1f6   :  { %v739_v43 = vpop.f32.mrb[10].mxu1  ;;  %v2060_v40 = vld [vmem:[%s2720_s13 + $0x120] ss:$28 sps:$4 sm:$0xff]   ;;  %v2066_v42 = vld [vmem:[%s2720_s13 + $0x158] ss:$28 sps:$4 sm:$0xff]  }
 0x1f7   :  { %v742_v45 = vmax.f32 %v737_v41, 0.0  ;;  %v1893_v46 = vpop.f32.mrb[11].mxu1  ;;  %v2068_v41 = vld [vmem:[%s2720_s13 + $0x15c] ss:$28 sps:$4 sm:$0xff]   ;;  %v2071_v43 = vld [vmem:[%s2720_s13 + $0x18c] ss:$28 sps:$4 sm:$0xff]  }
 0x1f8   :  { %v2069_v46 = vld [vmem:[%s2720_s13 + $0x188] ss:$28 sps:$4 sm:$0xff]  }
 0x1f9   :  { %v743_v47 = vpack.c.bf16 %v742_v45, %v742_v45  ;;  %v2074_v45 = vld [vmem:[%s2720_s13 + $0x194] ss:$28 sps:$4 sm:$0xff]  }
 0x1fb   :  { %1903 = vmatmul.mubr.msk.bf16.vlgmr.msra.gmra.mrb[8].mxu0 %vm783_vm2, %v743_v47  ;;  %v2072_v47 = vld [vmem:[%s2720_s13 + $0x190] ss:$28 sps:$4 sm:$0xff]  }
 0x1fc   :  { %1918 = vmatprep.mubr.msk.bf16.mxu0 %vm2146_vm0, %v2145_v44  ;;  %1915 = vmatpush3.bf16.msra.mxu0 %v2021_v49  ;;  %v2147_v49 = vmov 0  }
 0x1fd   :  { %1916 = vmatprep.subr.bf16.mxu0 %v2145_v44 }
 0x200   :  { %1917 = vmatpush3.bf16.msra.mxu0 %v2022_v58  ;;  %v2078_v58 = vld [vmem:[%s2720_s13 + $0x18] ss:$28 sps:$4 sm:$0xff]  }
 0x201   :  { %1439 = vmatprep.subr.bf16.mxu0 %v2029_v8  ;;  %v2097_v8 = vld [vmem:[%s2720_s13 + $0x12c] ss:$28 sps:$4 sm:$0xff]  }
 0x2ce   :  { %v821_v51 = vpop.f32.mrb[8].mxu0 }
 0x2cf   :  { %v822_v52 = vadd.f32 %v1690_v50, %v821_v51  ;;  %v1904_v53 = vpop.f32.mrb[9].mxu0  ;;  %v1704_v50 = vld [vmem:[%s2719_s12] ss:$0 sm:$0xff] }
 0x2d0   :  { %v824_v54 = vpop.f32.mrb[10].mxu0 }
 0x2d1   :  { %v827_v55 = vmax.f32 %v822_v52, 0.0  ;;  %v1905_v56 = vpop.f32.mrb[11].mxu0 }
 0x2d3   :  { %v828_v57 = vpack.c.bf16 %v827_v55, %v827_v55 }
 0x2d5   :  { %1911 = vmatmul.mubr.msk.bf16.vlgmr.msra.gmra.mrb[12].mxu1 %vm852_vm3, %v828_v57  ;;  %v2075_v57 = vld [vmem:[%s2720_s13 + $0x10] ss:$28 sps:$4 sm:$0xff]  }
 0x2d6   :  { %1930 = vmatprep.mubr.msk.bf16.mxu1 %vm2146_vm0, %v2145_v44  ;;  %1923 = vmatpush3.bf16.msra.mxu1 %v2023_v59 }
 0x2d7   :  { %1924 = vmatprep.subr.bf16.mxu1 %v2145_v44 }
 0x2da   :  { %1925 = vmatpush3.bf16.msra.mxu1 %v2024_v60  ;;  %v2081_v60 = vld [vmem:[%s2720_s13 + $0x4c] ss:$28 sps:$4 sm:$0xff]  }
 0x2db   :  { %1926 = vmatprep.subr.bf16.mxu1 %v2145_v44 }
 0x2de   :  { %1927 = vmatpush3.bf16.msra.mxu1 %v2025_v5  ;;  %v2093_v5 = vld [vmem:[%s2720_s13 + $0xf4] ss:$28 sps:$4 sm:$0xff]  }
 0x2df   :  { %1928 = vmatprep.subr.bf16.mxu1 %v2145_v44 }
 0x2e2   :  { %1929 = vmatpush3.bf16.msra.mxu1 %v2026_v6  ;;  %v2091_v6 = vld [vmem:[%s2720_s13 + $0xf0] ss:$28 sps:$4 sm:$0xff]  }
 0x2e3   :  { %1480 = vmatprep.subr.bf16.mxu1 %v2032_v9  ;;  %v2095_v9 = vld [vmem:[%s2720_s13 + $0x128] ss:$28 sps:$4 sm:$0xff]  }
 0x3a8   :  { %v890_v62 = vpop.f32.mrb[12].mxu1 }
 0x3a9   :  { %v891_v63 = vadd.f32 %v1696_v61, %v890_v62  ;;  %v1912_v0 = vpop.f32.mrb[13].mxu1  ;;  %v2079_v61 = vld [vmem:[%s2720_s13 + $0x48] ss:$28 sps:$4 sm:$0xff]   ;;  %v2082_v62 = vld [vmem:[%s2720_s13 + $0x50] ss:$28 sps:$4 sm:$0xff]  }
 0x3aa   :  { %v893_v1 = vpop.f32.mrb[14].mxu1  ;;  %v2083_v0 = vld [vmem:[%s2720_s13 + $0x80] ss:$28 sps:$4 sm:$0xff]  }
 0x3ab   :  { %v896_v2 = vmax.f32 %v891_v63, 0.0  ;;  %v1913_v3 = vpop.f32.mrb[15].mxu1  ;;  %v2085_v63 = vld [vmem:[%s2720_s13 + $0x84] ss:$28 sps:$4 sm:$0xff]  }
 0x3ac   :  { %v2086_v1 = vld [vmem:[%s2720_s13 + $0x88] ss:$28 sps:$4 sm:$0xff]   ;;  %v2087_v3 = vld [vmem:[%s2720_s13 + $0xb8] ss:$28 sps:$4 sm:$0xff]  }
 0x3ad   :  { %v897_v4 = vpack.c.bf16 %v896_v2, %v896_v2  ;;  %v2089_v2 = vld [vmem:[%s2720_s13 + $0xbc] ss:$28 sps:$4 sm:$0xff]  }
 0x3af   :  { %1919 = vmatmul.mubr.msk.bf16.vlgmr.msra.gmra.mrb[12].mxu0 %vm852_vm3, %v897_v4  ;;  %v2090_v4 = vld [vmem:[%s2720_s13 + $0xc0] ss:$28 sps:$4 sm:$0xff]  }
 0x3b0   :  { %1440 = vmatpush1.bf16.msra.mxu0 %v2027_v7  ;;  %1471 = vmatprep.mubr.bf16.mxu0 %v2147_v49  ;;  %v2094_v7 = vld [vmem:[%s2720_s13 + $0xf8] ss:$28 sps:$4 sm:$0xff]  }
 0x3b1   :  { %1441 = vmatprep.subr.bf16.mxu0 %v2035_v10  ;;  %v2098_v10 = vld [vmem:[%s2720_s13 + $0x130] ss:$28 sps:$4 sm:$0xff]  }
 0x3b4   :  { %1442 = vmatpush1.bf16.msra.mxu0 %v2033_v11  ;;  %v2101_v11 = vld [vmem:[%s2720_s13 + $0x164] ss:$28 sps:$4 sm:$0xff]  }
 0x3b5   :  { %1443 = vmatprep.subr.bf16.mxu0 %v2041_v12  ;;  %v2099_v12 = vld [vmem:[%s2720_s13 + $0x160] ss:$28 sps:$4 sm:$0xff]  }
 0x3b8   :  { %1444 = vmatpush1.bf16.msra.mxu0 %v2039_v13  ;;  %v2102_v13 = vld [vmem:[%s2720_s13 + $0x168] ss:$28 sps:$4 sm:$0xff]  }
 0x3b9   :  { %1445 = vmatprep.subr.bf16.mxu0 %v2047_v14  ;;  %v2105_v14 = vld [vmem:[%s2720_s13 + $0x19c] ss:$28 sps:$4 sm:$0xff]  }
 0x3bc   :  { %1446 = vmatpush1.bf16.msra.mxu0 %v2045_v15  ;;  %v2103_v15 = vld [vmem:[%s2720_s13 + $0x198] ss:$28 sps:$4 sm:$0xff]  }
 0x3bd   :  { %1447 = vmatprep.subr.bf16.mxu0 %v2053_v16  ;;  %v2106_v16 = vld [vmem:[%s2720_s13 + $0x1a0] ss:$28 sps:$4 sm:$0xff]   ;;  %s2148_s13 = smov [#allocation2]  }
 0x3c0   :  { %1448 = vmatpush1.bf16.msra.mxu0 %v2051_v17  ;;  %v1116_v17 = vlaneseq }
 0x3c1   :  { %1449 = vmatprep.subr.bf16.mxu0 %v2059_v18 }
 0x3c2   :  { %v1117_v18 = vshrl.u32 %v1116_v17, 7 }
 0x3c4   :  { %1450 = vmatpush1.bf16.msra.mxu0 %v2057_v19  ;;  %v1118_v19 = vsub.s32 0, %v1117_v18 }
 0x3c5   :  { %1451 = vmatprep.subr.bf16.mxu0 %v2065_v20  ;;  %v1126_v20 = vsub.s32 2, %v1117_v18 }
 0x3c8   :  { %1452 = vmatpush1.bf16.msra.mxu0 %v2063_v21  ;;  %v1114_v21 = vld [vmem:[%s2721_s14] sm:$0x7f]  ;;  %s1622_s14 = sshll.u32 %s2148_s13, 4  ;;  %s1623_s14 = int_to_ptr.vmem [resolvable:$true] %s1622_s14 }
 0x3c9   :  { %1453 = vmatprep.subr.bf16.mxu0 %v2071_v43  ;;  %v1134_v43 = vsub.s32 4, %v1117_v18  ;;  %s2121_s19 = scalar_lea.vmem %s1623_s14, 896  ;;  %p2126_p1 = scmp.lt.s32.totalorder %s1623_s14, %s1623_s14 }
 0x3ca   :  { %p2122_p0 = scmp.ne.s32.totalorder %s1623_s14, %s2121_s19  ;;  %p2127_p2 = scmp.lt.s32.totalorder %s2121_s19, %s2121_s19 }
 0x3cc   :  { %1454 = vmatpush1.bf16.msra.mxu0 %v2069_v46  ;;  %v1138_v46 = vsub.s32 5, %v1117_v18  ;;  %p2128_p3 = por %p2127_p2, %p2126_p1 }
 0x3cd   :  { %1521 = vmatprep.subr.bf16.mxu0 %v2077_v48 }
 0x3ce   :  { %p2129_p4 = pnand %p2128_p3, %p2122_p0 }
 0x482   :  { %v958_v23 = vpop.f32.mrb[12].mxu0 }
 0x483   :  { %v959_v24 = vadd.f32 %v1700_v22, %v958_v23  ;;  %v1920_v25 = vpop.f32.mrb[13].mxu0  ;;  %v1122_v22 = vsub.s32 1, %v1117_v18  ;;  %v1130_v23 = vsub.s32 3, %v1117_v18 }
 0x484   :  { %v961_v26 = vpop.f32.mrb[14].mxu0  ;;  %v1127_v25 = vrot.slane %v1114_v21, %v1126_v20 }
 0x485   :  { %v964_v27 = vmax.f32 %v959_v24, 0.0  ;;  %v1921_v28 = vpop.f32.mrb[15].mxu0  ;;  %v1119_v24 = vrot.slane %v1114_v21, %v1118_v19  ;;  %v1123_v26 = vrot.slane %v1114_v21, %v1122_v22 }
 0x487   :  { %v965_v30 = vpack.c.bf16 %v964_v27, %v964_v27  ;;  %v1131_v27 = vrot.slane %v1114_v21, %v1130_v23 }
 0x489   :  { %1931 = vmatmul.mubr.msk.bf16.vlgmr.msra.gmra.mrb[16].mxu1 %vm783_vm2, %v965_v30 }
 0x48a   :  { %1481 = vmatpush1.bf16.msra.mxu1 %v2030_v29  ;;  %1512 = vmatprep.mubr.bf16.mxu1 %v2147_v49 }
 0x48b   :  { %1482 = vmatprep.subr.bf16.mxu1 %v2038_v31 }
 0x48e   :  { %1483 = vmatpush1.bf16.msra.mxu1 %v2036_v32 }
 0x48f   :  { %1484 = vmatprep.subr.bf16.mxu1 %v2044_v33 }
 0x492   :  { %1485 = vmatpush1.bf16.msra.mxu1 %v2042_v34 }
 0x493   :  { %1486 = vmatprep.subr.bf16.mxu1 %v2050_v35 }
 0x496   :  { %1487 = vmatpush1.bf16.msra.mxu1 %v2048_v36 }
 0x497   :  { %1488 = vmatprep.subr.bf16.mxu1 %v2056_v37 }
 0x49a   :  { %1489 = vmatpush1.bf16.msra.mxu1 %v2054_v38 }
 0x49b   :  { %1490 = vmatprep.subr.bf16.mxu1 %v2062_v39 }
 0x49e   :  { %1491 = vmatpush1.bf16.msra.mxu1 %v2060_v40 }
 0x49f   :  { %1492 = vmatprep.subr.bf16.mxu1 %v2068_v41 }
 0x4a2   :  { %1493 = vmatpush1.bf16.msra.mxu1 %v2066_v42 }
 0x4a3   :  { %1494 = vmatprep.subr.bf16.mxu1 %v2074_v45  ;;  %v1142_v45 = vsub.s32 6, %v1117_v18 }
 0x4a5   :  { %v1143_v48 = vrot.slane %v1114_v21, %v1142_v45 }
 0x4a6   :  { %1495 = vmatpush1.bf16.msra.mxu1 %v2072_v47  ;;  %v1135_v47 = vrot.slane %v1114_v21, %v1134_v43 }
 0x4a7   :  { %1934 = vmatprep.subr.bf16.mxu1 %v2145_v44 }
 0x55c   :  { %v1042_v51 = vpop.f32.mrb[16].mxu1 }
 0x55d   :  { %v1043_v52 = vadd.f32 %v1704_v50, %v1042_v51  ;;  %v1932_v53 = vpop.f32.mrb[17].mxu1 }
 0x55e   :  { %v1045_v54 = vpop.f32.mrb[18].mxu1 }
 0x55f   :  { %v1048_v55 = vmax.f32 %v1043_v52, 0.0  ;;  %v1933_v56 = vpop.f32.mrb[19].mxu1 }
 0x561   :  { %v1049_v59 = vpack.c.bf16 %v1048_v55, %v1048_v55 }
 0x563   :  { %1472 = vmatmul.mubr.bf16.vlgmr.msra.gmra.mrb[16].mxu0 %v1049_v59  ;;  %1513 = vmatmul.mubr.bf16.vlgmr.msra.gmra.mrb[20].mxu1 %v1049_v59 }
 0x564   :  { %1522 = vmatpush1.bf16.msra.mxu0 %v2075_v57  ;;  %1935 = vmatpush3.bf16.msra.mxu1 %v2078_v58 }
 0x565   :  { %1523 = vmatprep.subr.bf16.mxu0 %v2081_v60  ;;  %1936 = vmatprep.subr.bf16.mxu1 %v2145_v44 }
 0x566   :  { %1553 = vmatprep.mubr.bf16.mxu0 %v2147_v49  ;;  %1950 = vmatprep.mubr.msk.bf16.mxu1 %vm2146_vm0, %v2145_v44  ;;  %v1139_v49 = vrot.slane %v1114_v21, %v1138_v46 }
 0x568   :  { %1524 = vmatpush1.bf16.msra.mxu0 %v2079_v61  ;;  %1937 = vmatpush3.bf16.msra.mxu1 %v2082_v62 }
 0x569   :  { %1525 = vmatprep.subr.bf16.mxu0 %v2085_v63  ;;  %1938 = vmatprep.subr.bf16.mxu1 %v2145_v44 }
 0x56c   :  { %1526 = vmatpush1.bf16.msra.mxu0 %v2083_v0  ;;  %1939 = vmatpush3.bf16.msra.mxu1 %v2086_v1 }
 0x56d   :  { %1527 = vmatprep.subr.bf16.mxu0 %v2089_v2  ;;  %1940 = vmatprep.subr.bf16.mxu1 %v2145_v44 }
 0x570   :  { %1528 = vmatpush1.bf16.msra.mxu0 %v2087_v3  ;;  %1941 = vmatpush3.bf16.msra.mxu1 %v2090_v4 }
 0x571   :  { %1529 = vmatprep.subr.bf16.mxu0 %v2093_v5  ;;  %1942 = vmatprep.subr.bf16.mxu1 %v2145_v44 }
 0x574   :  { %1530 = vmatpush1.bf16.msra.mxu0 %v2091_v6  ;;  %1943 = vmatpush3.bf16.msra.mxu1 %v2094_v7 }
 0x575   :  { %1531 = vmatprep.subr.bf16.mxu0 %v2097_v8  ;;  %1944 = vmatprep.subr.bf16.mxu1 %v2145_v44 }
 0x578   :  { %1532 = vmatpush1.bf16.msra.mxu0 %v2095_v9  ;;  %1945 = vmatpush3.bf16.msra.mxu1 %v2098_v10 }
 0x579   :  { %1533 = vmatprep.subr.bf16.mxu0 %v2101_v11  ;;  %1946 = vmatprep.subr.bf16.mxu1 %v2145_v44 }
 0x57c   :  { %1534 = vmatpush1.bf16.msra.mxu0 %v2099_v12  ;;  %1947 = vmatpush3.bf16.msra.mxu1 %v2102_v13 }
 0x57d   :  { %1535 = vmatprep.subr.bf16.mxu0 %v2105_v14  ;;  %1948 = vmatprep.subr.bf16.mxu1 %v2145_v44 }
 0x580   :  { %1536 = vmatpush1.bf16.msra.mxu0 %v2103_v15  ;;  %1949 = vmatpush3.bf16.msra.mxu1 %v2106_v16 }
 0x583   :  { %1554 = vmatmul.mubr.bf16.vlgmr.msra.gmra.mrb[20].mxu0 %v1049_v59  ;;  %1951 = vmatmul.mubr.bf16.vlgmr.msra.gmra.mrb[24].mxu1 %v1049_v59 }
 0x636   :  { %v1473_v28 = vpop.f32.mrb[16].mxu0  ;;  %v1514_v44 = vpop.f32.mrb[20].mxu1 }
 0x637   :  { %v1474_v29 = vadd.f32 %v1473_v28, %v1119_v24  ;;  %v1515_v30 = vadd.f32 %v1514_v44, %v1127_v25  ;;  %v1475_v31 = vpop.f32.mrb[17].mxu0  ;;  %v1516_v32 = vpop.f32.mrb[21].mxu1 }
 0x638   :  { %v1476_v33 = vadd.f32 %v1475_v31, %v1123_v26  ;;  %v1517_v34 = vadd.f32 %v1516_v32, %v1131_v27  ;;  %v1477_v35 = vpop.f32.mrb[18].mxu0  ;;  %v1518_v36 = vpop.f32.mrb[22].mxu1 }
 0x639   :  { %2107 = vtanh.f32 %v1474_v29  ;;  %v1478_v37 = vpop.f32.mrb[19].mxu0  ;;  %v1519_v38 = vpop.f32.mrb[23].mxu1 }
 0x63a   :  { %2109 = vtanh.f32 %v1515_v30 }
 0x63b   :  { %2111 = vtanh.f32 %v1476_v33 }
 0x63c   :  { %2113 = vtanh.f32 %v1517_v34 }
 0x643   :  { %v2108_v39 = vpop.eup %2107 }
 0x644   :  { %v2110_v40 = vpop.eup %2109  ;;  %1609 = vst [vmem:[#allocation2] sm:$0xff] %v2108_v39 }
 0x645   :  { %v2112_v41 = vpop.eup %2111  ;;  %1611 = vst [vmem:[#allocation2 + $0x10] sm:$0xff] %v2110_v40 }
 0x646   :  { %v2114_v42 = vpop.eup %2113  ;;  %1610 = vst [vmem:[#allocation2 + $0x8] sm:$0xff] %v2112_v41 }
 0x647   :  { %1612 = vst [vmem:[#allocation2 + $0x18] sm:$0xff] %v2114_v42 }
 0x656   :  { %v1555_v50 = vpop.f32.mrb[20].mxu0  ;;  %v1596_v51 = vpop.f32.mrb[24].mxu1 }
 0x657   :  { %v1556_v52 = vadd.f32 %v1555_v50, %v1135_v47  ;;  %v1597_v53 = vadd.f32 %v1596_v51, %v1143_v48  ;;  %v1557_v54 = vpop.f32.mrb[21].mxu0  ;;  %v1952_v55 = vpop.f32.mrb[25].mxu1 }
 0x658   :  { %v1558_v56 = vadd.f32 %v1557_v54, %v1139_v49  ;;  %v1559_v57 = vpop.f32.mrb[22].mxu0  ;;  %v1599_v58 = vpop.f32.mrb[26].mxu1 }
 0x659   :  { %2115 = vtanh.f32 %v1556_v52  ;;  %v1560_v59 = vpop.f32.mrb[23].mxu0  ;;  %v1953_v60 = vpop.f32.mrb[27].mxu1 }
 0x65a   :  { %2117 = vtanh.f32 %v1597_v53 }
 0x65b   :  { %2119 = vtanh.f32 %v1558_v56 }
 0x663   :  { %v2116_v61 = vpop.eup %2115 }
 0x664   :  { %v2118_v62 = vpop.eup %2117  ;;  %1613 = vst [vmem:[#allocation2 + $0x20] sm:$0xff] %v2116_v61 }
 0x665   :  { %v2120_v63 = vpop.eup %2119  ;;  %1615 = vst.msk [vmem:[#allocation2 + $0x30] sm:$0xff] %vm465_vm1, %v2118_v62 }
 0x666   :  { %1614 = vst [vmem:[#allocation2 + $0x28] sm:$0xff] %v2120_v63 }
 0x667   :  { %2132 = shalt.err (!%p2129_p4)
}
 0x668   :  { %s2133_s20 = scalar_lea.hbm %s2722_s15, 896 }
 0x669   :  { %p2134_p5 = scmp.ne.s32.totalorder %s2722_s15, %s2133_s20  ;;  %p2137_p6 = scmp.lt.u32.totalorder %s2133_s20, %s2722_s15 }
 0x66b   :  { %p2139_p7 = pnand %p2137_p6, %p2134_p5 }
 0x66d   :  { %2142 = shalt.err (!%p2139_p7)
}
 0x66e   :  { %1625 = dma.vmem_to_hbm [thread:$0]  %s1623_s14, 896, %s2722_s15, [#allocation3]  }
 0x66f   :  { %2143 = dma.done.wait [#allocation3], 896  }
 0x670   :  { %2144 = vsyncadd [#allocation3], 4294966400 }
 0x671   :  { %1629 = vsyncpa [#allocation3], 1 }

</bundles_post_ra>
